<compile_context>
chip_gen: v7x
topology: tpu7x:2x2x1
jax: 0.10.0
libtpu: 0.0.40
codegen_flags: <defaults>
</compile_context>

<pallas_src>
import functools
import numpy as np
import jax
import jax.numpy as jnp
from jax.experimental import pallas as pl
from jax.experimental.pallas import tpu as pltpu

# ---- small synthetic sizes, consistent with the module's __init__ ----------
NUM_BASE = 20               # configs['num_base']
NUM_NOVEL = 12              # configs['num_novel']
N_CLS_TOTAL = 1 + NUM_BASE + NUM_NOVEL   # background + base + novel prompts
BERT_DIM = 768              # BERT-base hidden (word-embedding width)
PROJ_DIM = 256              # Alpro text_proj / trajectory embedding dim
SO_DIM = 2 * PROJ_DIM       # 512: cat(subj, obj) and relpos2embd output dim
RELPOS_DIM = 12             # relpos2embd = Linear(12,256)+ReLU+Linear(256,512)
N_CLS_PAD = 128             # class axis padded to one full lane tile
MAX_TRIPLETS = 4            # GT triplets per sample (padded with -1)
TEMPERATURE = 0.07          # configs['temperature']
FOCAL_ALPHA = 0.25          # torchvision sigmoid_focal_loss defaults
FOCAL_GAMMA = 2.0           # gamma fixed at 2 -> hard-coded as x*x in-kernel
BSZ = 8
_INV_SQRT2 = 0.7071067811865476

_VMEM = functools.partial(pl.BlockSpec, memory_space=pltpu.MemorySpace.VMEM)


# ---------------------------------------------------------------------------
# Fused kernel: classifier weights + so/relpos embeddings + logits + focal loss
# ---------------------------------------------------------------------------
def _fused_forward_kernel(s_ref, o_ref, rp_ref, pred_ref,
                          cls_t_ref, wp_ref, bp_ref,
                          w1_ref, b1_ref, w2_ref,
                          out_ref, *, temperature, alpha, n_cls):
    f32 = jnp.float32
    eps = 1e-12

    def l2norm(v):  # normalize along the last (lane) axis via rsqrt (EUP)
        ss = jnp.sum(v * v, axis=-1, keepdims=True)
        return v * jax.lax.rsqrt(jnp.maximum(ss, eps))

    # --- classifier weights, emitted transposed: [PROJ_DIM, N_CLS_PAD] --------
    # TODO(synk): the frozen 12-layer BERT text encoder is not reproduced; the
    # [CLS] word embedding feeds text_proj directly, so the subj/obj prompt
    # branches coincide and the learnable ctx tokens do not reach this stub.
    y_t = jnp.dot(wp_ref[...], cls_t_ref[...],                 # bf16 x bf16 MXU
                  preferred_element_type=f32)                  # [256, 128] f32
    y_t = y_t + bp_ref[...]                                    # + [256, 1] bias
    ss_c = jnp.sum(y_t * y_t, axis=0, keepdims=True)           # [1, 128]
    cw_t = y_t * jax.lax.rsqrt(jnp.maximum(ss_c, eps))         # F.normalize cols

    # --- so_embds = cat([norm(s), norm(o)], -1) / sqrt(2)  (kept in halves) ---
    s_n = l2norm(s_ref[...])                                   # [B, 256]
    o_n = l2norm(o_ref[...])                                   # [B, 256]

    # --- relpos2embd: Linear(12,256) + ReLU + Linear(256,512, no bias) --------
    h = jnp.dot(rp_ref[...], w1_ref[...], preferred_element_type=f32) + b1_ref[...]
    h = jnp.maximum(h, 0.0)
    rel = l2norm(jnp.dot(h, w2_ref[...], preferred_element_type=f32))   # [B, 512]

    # combined = normalize(so + rel);  logits = combined @ cat([cw,cw],-1)^T/√2/T
    # with cw_subj == cw_obj (BERT stub) the 512-d contraction folds into
    # (lo + hi) @ cw_t, keeping everything 256-wide for the MXU.
    v_lo = s_n * _INV_SQRT2 + rel[:, :PROJ_DIM]
    v_hi = o_n * _INV_SQRT2 + rel[:, PROJ_DIM:]
    ss_v = jnp.sum(v_lo * v_lo + v_hi * v_hi, axis=-1, keepdims=True)   # [B, 1]
    z = (v_lo + v_hi) * jax.lax.rsqrt(jnp.maximum(ss_v, eps))           # [B, 256]
    logits = jnp.dot(z, cw_t, preferred_element_type=f32) * (_INV_SQRT2 / temperature)

    # --- multihot labels from (-1 padded) GT base-predicate ids ---------------
    bsz, n_pad = logits.shape
    col = jax.lax.broadcasted_iota(jnp.int32, (bsz, n_pad), 1)
    mh = jnp.zeros((bsz, n_pad), f32)
    for t in range(pred_ref.shape[1]):                 # static, tiny unroll
        mh = jnp.maximum(mh, (col == pred_ref[:, t:t + 1]).astype(f32))

    # --- sigmoid focal loss (alpha=0.25, gamma=2), mean over real bsz*n_cls ---
    # One shared exp(-|x|) feeds both the stable BCE-with-logits and sigmoid:
    #   sigmoid(x) = where(x>=0, 1, e) / (1+e)   with e = exp(-|x|)
    e = jnp.exp(-jnp.abs(logits))
    inv_1pe = 1.0 / (1.0 + e)
    p = jnp.where(logits >= 0.0, 1.0, e) * inv_1pe
    ce = jnp.maximum(logits, 0.0) - logits * mh + jnp.log(1.0 + e)
    p_t = p * mh + (1.0 - p) * (1.0 - mh)
    one_m = 1.0 - p_t
    a_t = alpha * mh + (1.0 - alpha) * (1.0 - mh)
    valid = (col < n_cls).astype(f32)                  # mask the padded lanes
    loss_el = a_t * ce * (one_m * one_m) * valid
    loss = jnp.sum(jnp.sum(loss_el, axis=1, keepdims=True), axis=0, keepdims=True)
    loss = loss * (1.0 / (bsz * n_cls))                # [1, 1], true denominator

    # --- single lane-dense output slab: logits in cols [0, n_cls), scalar loss
    #     packed at (row 0, col n_cls) -> no extra (1,1) output tile / DMA ------
    row = jax.lax.broadcasted_iota(jnp.int32, (bsz, n_pad), 0)
    slab = logits * valid
    slab = jnp.where(jnp.logical_and(row == 0, col == n_cls), loss, slab)
    out_ref[...] = slab


# ---------------------------------------------------------------------------
# Wrappers
# ---------------------------------------------------------------------------
def _prep_pred_ids(triplet_cls_ids, max_triplets=MAX_TRIPLETS):
    """Host-side batch collation: ragged GT triplets -> dense -1-padded
    zero-based base predicate ids (column 1 of each triplet, minus 1)."""
    bsz = len(triplet_cls_ids)
    out = np.full((bsz, max_triplets), -1, dtype=np.int32)
    for i, spo in enumerate(triplet_cls_ids):
        p = np.asarray(spo)[:, 1] - 1
        out[i, :min(len(p), max_triplets)] = p[:max_triplets]
    return jnp.asarray(out)


@jax.jit
def forward_on_gt_only(params, s_embds, o_embds, relpos_feats, pred_base_ids):
    """AlproPromptTrainer.forward_on_gt_only (base split). s_roi/o_roi feats are
    unused by the original forward and therefore not taken here."""
    bsz = s_embds.shape[0]

    # Frozen prompt/text-proj buffers: CLS word-embedding rows for the base
    # split, zero-padded to a 128-wide class axis and transposed so the kernel
    # emits cw^T directly (no in-kernel transpose).  bf16 MXU operands, f32 acc.
    cls_rows = params['prefix_embds'][1:NUM_BASE + 1, 0, :]            # [20, 768]
    cls_t = jnp.pad(cls_rows, ((0, N_CLS_PAD - NUM_BASE), (0, 0))).T   # [768, 128]
    cls_t = cls_t.astype(jnp.bfloat16)
    wp = params['text_proj_w'].astype(jnp.bfloat16)                    # [256, 768]
    bp = params['text_proj_b'].reshape(PROJ_DIM, 1)                    # [256, 1]

    slab = pl.pallas_call(
        functools.partial(_fused_forward_kernel, temperature=TEMPERATURE,
                          alpha=FOCAL_ALPHA, n_cls=NUM_BASE),
        out_shape=jax.ShapeDtypeStruct((bsz, N_CLS_PAD), jnp.float32),
        in_specs=[_VMEM()] * 10,
        out_specs=_VMEM(),
    )(s_embds, o_embds, relpos_feats, pred_base_ids,
      cls_t, wp, bp,
      params['relpos_w1'], params['relpos_b1'], params['relpos_w2'])

    loss = slab[0, NUM_BASE]            # scalar loss packed beside the logits
    # logits = slab[:, :NUM_BASE]       # (available to callers if needed)
    return loss, {'total': loss}


# ---------------------------------------------------------------------------
# Deterministic synthetic parameter init (shapes from the module's __init__)
# ---------------------------------------------------------------------------
def init_params(key):
    ks = jax.random.split(key, 6)
    p = {}
    # Frozen prompt buffer; only the [CLS] word-embedding row is consumed by the
    # stubbed text encoder.  suffix_embds / token_mask / subj|obj ctx_embds feed
    # only the omitted BERT layers and are not materialized here.
    # TODO(synk): frozen 12-layer BERT text encoder not reproduced.
    p['prefix_embds'] = 0.02 * jax.random.normal(
        ks[0], (N_CLS_TOTAL, 1, BERT_DIM), jnp.float32)
    # text_proj = nn.Linear(768, 256) - weight kept in PyTorch (out, in) layout.
    p['text_proj_w'] = (1.0 / np.sqrt(BERT_DIM)) * jax.random.normal(
        ks[1], (PROJ_DIM, BERT_DIM), jnp.float32)
    p['text_proj_b'] = 0.01 * jax.random.normal(ks[2], (PROJ_DIM,), jnp.float32)
    # relpos2embd = Linear(12,256) + ReLU + Linear(256,512, bias=False);
    # weights stored transposed (in, out) so the kernel computes x @ W + b.
    p['relpos_w1'] = (1.0 / np.sqrt(RELPOS_DIM)) * jax.random.normal(
        ks[3], (RELPOS_DIM, PROJ_DIM), jnp.float32)
    p['relpos_b1'] = 0.01 * jax.random.normal(ks[4], (1, PROJ_DIM), jnp.float32)
    p['relpos_w2'] = (1.0 / np.sqrt(PROJ_DIM)) * jax.random.normal(
        ks[5], (PROJ_DIM, SO_DIM), jnp.float32)
    return p


# pure-JAX reference for a sanity check (mirrors the module's math; uses the
# same bf16 operands for the 768-dim text_proj matmul as the kernel does)
def _ref_loss(params, s_embds, o_embds, relpos_feats, multihot):
    def l2n(v):
        return v / jnp.maximum(jnp.linalg.norm(v, axis=-1, keepdims=True), 1e-12)
    cls_rows = params['prefix_embds'][1:NUM_BASE + 1, 0, :]
    y = jnp.dot(cls_rows.astype(jnp.bfloat16),
                params['text_proj_w'].T.astype(jnp.bfloat16),
                preferred_element_type=jnp.float32) + params['text_proj_b'][None, :]
    ncw = l2n(y)                                            # subj == obj (stub)
    cw = jnp.concatenate([ncw, ncw], axis=-1) / np.sqrt(2.0)        # [20, 512]
    so = jnp.concatenate([l2n(s_embds), l2n(o_embds)], axis=-1) / np.sqrt(2.0)
    h = jnp.maximum(relpos_feats @ params['relpos_w1'] + params['relpos_b1'], 0.0)
    rel = l2n(h @ params['relpos_w2'])
    comb = l2n(so + rel)
    logits = comb @ cw.T / TEMPERATURE
    p = jax.nn.sigmoid(logits)
    ce = jnp.maximum(logits, 0.0) - logits * multihot + jnp.log(1.0 + jnp.exp(-jnp.abs(logits)))
    p_t = p * multihot + (1.0 - p) * (1.0 - multihot)
    a_t = FOCAL_ALPHA * multihot + (1.0 - FOCAL_ALPHA) * (1.0 - multihot)
    return jnp.mean(a_t * ce * (1.0 - p_t) ** 2)


if __name__ == "__main__":
    key = jax.random.PRNGKey(0)
    pkey, dkey = jax.random.split(key)
    params = init_params(pkey)

    dks = jax.random.split(dkey, 5)
    s_roi = jax.random.normal(dks[0], (BSZ, 64), jnp.float32)   # unused by forward_on_gt_only
    o_roi = jax.random.normal(dks[1], (BSZ, 64), jnp.float32)   # unused by forward_on_gt_only
    s_embds = jax.random.normal(dks[2], (BSZ, PROJ_DIM), jnp.float32)
    o_embds = jax.random.normal(dks[3], (BSZ, PROJ_DIM), jnp.float32)
    relpos_feats = jax.random.normal(dks[4], (BSZ, RELPOS_DIM), jnp.float32)

    # deterministic synthetic ground-truth triplet class ids [n_triplets, 3]
    rng = np.random.RandomState(0)
    triplet_cls_ids = [rng.randint(1, NUM_BASE + 1, size=(3, 3)) for _ in range(BSZ)]
    pred_base_ids = _prep_pred_ids(triplet_cls_ids)   # host-side collation only

    loss, loss_for_show = forward_on_gt_only(
        params, s_embds, o_embds, relpos_feats, pred_base_ids)
    loss = jax.block_until_ready(loss)

    # sanity check vs pure-JAX reference
    multihot = np.zeros((BSZ, NUM_BASE), dtype=np.float32)
    for i in range(BSZ):
        multihot[i, np.asarray(triplet_cls_ids[i])[:, 1] - 1] = 1.0
    ref = float(_ref_loss(params, s_embds, o_embds, relpos_feats, jnp.asarray(multihot)))
    got = float(loss)
    assert np.isfinite(got)
    assert np.allclose(got, ref, rtol=2e-2, atol=2e-2), (got, ref)
    assert np.allclose(float(loss_for_show['total']), got)
    print("KERNEL_OK")
</pallas_src>

<mosaic_0001>
module attributes {stable_mosaic.version = 11 : i64} {
  func.func @_fused_forward_kernel(%arg0: memref<8x256xf32, #tpu.memory_space<vmem>>, %arg1: memref<8x256xf32, #tpu.memory_space<vmem>>, %arg2: memref<8x12xf32, #tpu.memory_space<vmem>>, %arg3: memref<8x4xi32, #tpu.memory_space<vmem>>, %arg4: memref<768x128xbf16, #tpu.memory_space<vmem>>, %arg5: memref<256x768xbf16, #tpu.memory_space<vmem>>, %arg6: memref<256x1xf32, #tpu.memory_space<vmem>>, %arg7: memref<12x256xf32, #tpu.memory_space<vmem>>, %arg8: memref<1x256xf32, #tpu.memory_space<vmem>>, %arg9: memref<256x512xf32, #tpu.memory_space<vmem>>, %arg10: memref<8x128xf32, #tpu.memory_space<vmem>>) attributes {dimension_semantics = [], scalar_prefetch = 0 : i64, scratch_operands = 0 : i64, tpu.core_type = #tpu.core_type<tc>} {
    %c0 = arith.constant 0 : index
    %c0_0 = arith.constant 0 : index
    %0 = vector.load %arg5[%c0, %c0_0] : memref<256x768xbf16, #tpu.memory_space<vmem>>, vector<256x768xbf16>
    %c0_1 = arith.constant 0 : index
    %c0_2 = arith.constant 0 : index
    %1 = vector.load %arg4[%c0_1, %c0_2] : memref<768x128xbf16, #tpu.memory_space<vmem>>, vector<768x128xbf16>
    %cst = arith.constant dense<0.000000e+00> : vector<256x128xf32>
    %2 = tpu.matmul %0, %1, %cst {dimension_numbers = #tpu.dot_dimension_numbers<[1], [0], [0], [1], [0, 0, 1, 1], [], []>} : vector<256x768xbf16>, vector<768x128xbf16>, vector<256x128xf32> -> vector<256x128xf32>
    %c0_3 = arith.constant 0 : index
    %c0_4 = arith.constant 0 : index
    %3 = vector.load %arg6[%c0_3, %c0_4] : memref<256x1xf32, #tpu.memory_space<vmem>>, vector<256x1xf32>
    %4 = vector.broadcast %3 : vector<256x1xf32> to vector<256x128xf32>
    %5 = arith.addf %2, %4 : vector<256x128xf32>
    %6 = arith.mulf %5, %5 : vector<256x128xf32>
    %cst_5 = arith.constant dense<0.000000e+00> : vector<128xf32>
    %7 = vector.multi_reduction <add>, %6, %cst_5 [0] : vector<256x128xf32> to vector<128xf32>
    %8 = vector.shape_cast %7 : vector<128xf32> to vector<1x128xf32>
    %cst_6 = arith.constant 9.99999996E-13 : f32
    %9 = vector.broadcast %cst_6 : f32 to vector<1x128xf32>
    %10 = arith.maximumf %8, %9 : vector<1x128xf32>
    %11 = math.rsqrt %10 : vector<1x128xf32>
    %12 = vector.broadcast %11 : vector<1x128xf32> to vector<256x128xf32>
    %13 = arith.mulf %5, %12 : vector<256x128xf32>
    %c0_7 = arith.constant 0 : index
    %c0_8 = arith.constant 0 : index
    %14 = vector.load %arg0[%c0_7, %c0_8] : memref<8x256xf32, #tpu.memory_space<vmem>>, vector<8x256xf32>
    %15 = arith.mulf %14, %14 : vector<8x256xf32>
    %cst_9 = arith.constant dense<0.000000e+00> : vector<8xf32>
    %16 = vector.multi_reduction <add>, %15, %cst_9 [1] : vector<8x256xf32> to vector<8xf32>
    %17 = vector.shape_cast %16 : vector<8xf32> to vector<8x1xf32>
    %cst_10 = arith.constant 9.99999996E-13 : f32
    %18 = vector.broadcast %cst_10 : f32 to vector<8x1xf32>
    %19 = arith.maximumf %17, %18 : vector<8x1xf32>
    %20 = math.rsqrt %19 : vector<8x1xf32>
    %21 = vector.broadcast %20 : vector<8x1xf32> to vector<8x256xf32>
    %22 = arith.mulf %14, %21 : vector<8x256xf32>
    %c0_11 = arith.constant 0 : index
    %c0_12 = arith.constant 0 : index
    %23 = vector.load %arg1[%c0_11, %c0_12] : memref<8x256xf32, #tpu.memory_space<vmem>>, vector<8x256xf32>
    %24 = arith.mulf %23, %23 : vector<8x256xf32>
    %cst_13 = arith.constant dense<0.000000e+00> : vector<8xf32>
    %25 = vector.multi_reduction <add>, %24, %cst_13 [1] : vector<8x256xf32> to vector<8xf32>
    %26 = vector.shape_cast %25 : vector<8xf32> to vector<8x1xf32>
    %cst_14 = arith.constant 9.99999996E-13 : f32
    %27 = vector.broadcast %cst_14 : f32 to vector<8x1xf32>
    %28 = arith.maximumf %26, %27 : vector<8x1xf32>
    %29 = math.rsqrt %28 : vector<8x1xf32>
    %30 = vector.broadcast %29 : vector<8x1xf32> to vector<8x256xf32>
    %31 = arith.mulf %23, %30 : vector<8x256xf32>
    %c0_15 = arith.constant 0 : index
    %c0_16 = arith.constant 0 : index
    %32 = vector.load %arg2[%c0_15, %c0_16] : memref<8x12xf32, #tpu.memory_space<vmem>>, vector<8x12xf32>
    %c0_17 = arith.constant 0 : index
    %c0_18 = arith.constant 0 : index
    %33 = vector.load %arg7[%c0_17, %c0_18] : memref<12x256xf32, #tpu.memory_space<vmem>>, vector<12x256xf32>
    %cst_19 = arith.constant dense<0.000000e+00> : vector<8x256xf32>
    %34 = tpu.matmul %32, %33, %cst_19 {dimension_numbers = #tpu.dot_dimension_numbers<[1], [0], [0], [1], [0, 0, 1, 1], [], []>} : vector<8x12xf32>, vector<12x256xf32>, vector<8x256xf32> -> vector<8x256xf32>
    %c0_20 = arith.constant 0 : index
    %c0_21 = arith.constant 0 : index
    %35 = vector.load %arg8[%c0_20, %c0_21] : memref<1x256xf32, #tpu.memory_space<vmem>>, vector<1x256xf32>
    %36 = vector.broadcast %35 : vector<1x256xf32> to vector<8x256xf32>
    %37 = arith.addf %34, %36 : vector<8x256xf32>
    %cst_22 = arith.constant 0.000000e+00 : f32
    %38 = vector.broadcast %cst_22 : f32 to vector<8x256xf32>
    %39 = arith.maximumf %37, %38 : vector<8x256xf32>
    %c0_23 = arith.constant 0 : index
    %c0_24 = arith.constant 0 : index
    %40 = vector.load %arg9[%c0_23, %c0_24] : memref<256x512xf32, #tpu.memory_space<vmem>>, vector<256x512xf32>
    %cst_25 = arith.constant dense<0.000000e+00> : vector<8x512xf32>
    %41 = tpu.matmul %39, %40, %cst_25 {dimension_numbers = #tpu.dot_dimension_numbers<[1], [0], [0], [1], [0, 0, 1, 1], [], []>} : vector<8x256xf32>, vector<256x512xf32>, vector<8x512xf32> -> vector<8x512xf32>
    %42 = arith.mulf %41, %41 : vector<8x512xf32>
    %cst_26 = arith.constant dense<0.000000e+00> : vector<8xf32>
    %43 = vector.multi_reduction <add>, %42, %cst_26 [1] : vector<8x512xf32> to vector<8xf32>
    %44 = vector.shape_cast %43 : vector<8xf32> to vector<8x1xf32>
    %cst_27 = arith.constant 9.99999996E-13 : f32
    %45 = vector.broadcast %cst_27 : f32 to vector<8x1xf32>
    %46 = arith.maximumf %44, %45 : vector<8x1xf32>
    %47 = math.rsqrt %46 : vector<8x1xf32>
    %48 = vector.broadcast %47 : vector<8x1xf32> to vector<8x512xf32>
    %49 = arith.mulf %41, %48 : vector<8x512xf32>
    %cst_28 = arith.constant 0.707106769 : f32
    %50 = vector.broadcast %cst_28 : f32 to vector<8x256xf32>
    %51 = arith.mulf %22, %50 : vector<8x256xf32>
    %52 = vector.extract_strided_slice %49 {offsets = [0, 0], sizes = [8, 256], strides = [1, 1]} : vector<8x512xf32> to vector<8x256xf32>
    %53 = arith.addf %51, %52 : vector<8x256xf32>
    %cst_29 = arith.constant 0.707106769 : f32
    %54 = vector.broadcast %cst_29 : f32 to vector<8x256xf32>
    %55 = arith.mulf %31, %54 : vector<8x256xf32>
    %56 = vector.extract_strided_slice %49 {offsets = [0, 256], sizes = [8, 256], strides = [1, 1]} : vector<8x512xf32> to vector<8x256xf32>
    %57 = arith.addf %55, %56 : vector<8x256xf32>
    %58 = arith.mulf %53, %53 : vector<8x256xf32>
    %59 = arith.mulf %57, %57 : vector<8x256xf32>
    %60 = arith.addf %58, %59 : vector<8x256xf32>
    %cst_30 = arith.constant dense<0.000000e+00> : vector<8xf32>
    %61 = vector.multi_reduction <add>, %60, %cst_30 [1] : vector<8x256xf32> to vector<8xf32>
    %62 = vector.shape_cast %61 : vector<8xf32> to vector<8x1xf32>
    %63 = arith.addf %53, %57 : vector<8x256xf32>
    %cst_31 = arith.constant 9.99999996E-13 : f32
    %64 = vector.broadcast %cst_31 : f32 to vector<8x1xf32>
    %65 = arith.maximumf %62, %64 : vector<8x1xf32>
    %66 = math.rsqrt %65 : vector<8x1xf32>
    %67 = vector.broadcast %66 : vector<8x1xf32> to vector<8x256xf32>
    %68 = arith.mulf %63, %67 : vector<8x256xf32>
    %cst_32 = arith.constant dense<0.000000e+00> : vector<8x128xf32>
    %69 = tpu.matmul %68, %13, %cst_32 {dimension_numbers = #tpu.dot_dimension_numbers<[1], [0], [0], [1], [0, 0, 1, 1], [], []>} : vector<8x256xf32>, vector<256x128xf32>, vector<8x128xf32> -> vector<8x128xf32>
    %cst_33 = arith.constant 10.1015253 : f32
    %70 = vector.broadcast %cst_33 : f32 to vector<8x128xf32>
    %71 = arith.mulf %69, %70 : vector<8x128xf32>
    %72 = tpu.iota {dimensions = array<i32: 1>} : vector<8x128xi32>
    %cst_34 = arith.constant 0.000000e+00 : f32
    %73 = vector.broadcast %cst_34 : f32 to vector<8x128xf32>
    %c0_35 = arith.constant 0 : index
    %c0_36 = arith.constant 0 : index
    %74 = vector.load %arg3[%c0_35, %c0_36] : memref<8x4xi32, #tpu.memory_space<vmem>>, vector<8x1xi32>
    %75 = vector.broadcast %74 : vector<8x1xi32> to vector<8x128xi32>
    %76 = arith.cmpi eq, %72, %75 : vector<8x128xi32>
    %77 = arith.extui %76 : vector<8x128xi1> to vector<8x128xi32>
    %78 = arith.sitofp %77 : vector<8x128xi32> to vector<8x128xf32>
    %79 = arith.maximumf %73, %78 : vector<8x128xf32>
    %c0_37 = arith.constant 0 : index
    %c1 = arith.constant 1 : index
    %80 = vector.load %arg3[%c0_37, %c1] : memref<8x4xi32, #tpu.memory_space<vmem>>, vector<8x1xi32>
    %81 = vector.broadcast %80 : vector<8x1xi32> to vector<8x128xi32>
    %82 = arith.cmpi eq, %72, %81 : vector<8x128xi32>
    %83 = arith.extui %82 : vector<8x128xi1> to vector<8x128xi32>
    %84 = arith.sitofp %83 : vector<8x128xi32> to vector<8x128xf32>
    %85 = arith.maximumf %79, %84 : vector<8x128xf32>
    %c0_38 = arith.constant 0 : index
    %c2 = arith.constant 2 : index
    %86 = vector.load %arg3[%c0_38, %c2] : memref<8x4xi32, #tpu.memory_space<vmem>>, vector<8x1xi32>
    %87 = vector.broadcast %86 : vector<8x1xi32> to vector<8x128xi32>
    %88 = arith.cmpi eq, %72, %87 : vector<8x128xi32>
    %89 = arith.extui %88 : vector<8x128xi1> to vector<8x128xi32>
    %90 = arith.sitofp %89 : vector<8x128xi32> to vector<8x128xf32>
    %91 = arith.maximumf %85, %90 : vector<8x128xf32>
    %c0_39 = arith.constant 0 : index
    %c3 = arith.constant 3 : index
    %92 = vector.load %arg3[%c0_39, %c3] : memref<8x4xi32, #tpu.memory_space<vmem>>, vector<8x1xi32>
    %93 = vector.broadcast %92 : vector<8x1xi32> to vector<8x128xi32>
    %94 = arith.cmpi eq, %72, %93 : vector<8x128xi32>
    %95 = arith.extui %94 : vector<8x128xi1> to vector<8x128xi32>
    %96 = arith.sitofp %95 : vector<8x128xi32> to vector<8x128xf32>
    %97 = arith.maximumf %91, %96 : vector<8x128xf32>
    %98 = math.absf %71 : vector<8x128xf32>
    %cst_40 = arith.constant 0.000000e+00 : f32
    %99 = vector.broadcast %cst_40 : f32 to vector<8x128xf32>
    %100 = arith.subf %99, %98 : vector<8x128xf32>
    %101 = math.exp %100 : vector<8x128xf32>
    %cst_41 = arith.constant 1.000000e+00 : f32
    %102 = vector.broadcast %cst_41 : f32 to vector<8x128xf32>
    %103 = arith.addf %102, %101 : vector<8x128xf32>
    %cst_42 = arith.constant 1.000000e+00 : f32
    %104 = vector.broadcast %cst_42 : f32 to vector<8x128xf32>
    %105 = arith.divf %104, %103 : vector<8x128xf32>
    %cst_43 = arith.constant 0.000000e+00 : f32
    %106 = vector.broadcast %cst_43 : f32 to vector<8x128xf32>
    %107 = arith.cmpf oge, %71, %106 : vector<8x128xf32>
    %cst_44 = arith.constant 1.000000e+00 : f32
    %108 = vector.broadcast %cst_44 : f32 to vector<8x128xf32>
    %109 = arith.select %107, %108, %101 : vector<8x128xi1>, vector<8x128xf32>
    %110 = arith.mulf %109, %105 : vector<8x128xf32>
    %cst_45 = arith.constant 0.000000e+00 : f32
    %111 = vector.broadcast %cst_45 : f32 to vector<8x128xf32>
    %112 = arith.maximumf %71, %111 : vector<8x128xf32>
    %113 = arith.mulf %71, %97 : vector<8x128xf32>
    %114 = arith.subf %112, %113 : vector<8x128xf32>
    %cst_46 = arith.constant 1.000000e+00 : f32
    %115 = vector.broadcast %cst_46 : f32 to vector<8x128xf32>
    %116 = arith.addf %115, %101 : vector<8x128xf32>
    %117 = math.log %116 : vector<8x128xf32>
    %118 = arith.addf %114, %117 : vector<8x128xf32>
    %119 = arith.mulf %110, %97 : vector<8x128xf32>
    %cst_47 = arith.constant 1.000000e+00 : f32
    %120 = vector.broadcast %cst_47 : f32 to vector<8x128xf32>
    %121 = arith.subf %120, %110 : vector<8x128xf32>
    %cst_48 = arith.constant 1.000000e+00 : f32
    %122 = vector.broadcast %cst_48 : f32 to vector<8x128xf32>
    %123 = arith.subf %122, %97 : vector<8x128xf32>
    %124 = arith.mulf %121, %123 : vector<8x128xf32>
    %125 = arith.addf %119, %124 : vector<8x128xf32>
    %cst_49 = arith.constant 1.000000e+00 : f32
    %126 = vector.broadcast %cst_49 : f32 to vector<8x128xf32>
    %127 = arith.subf %126, %125 : vector<8x128xf32>
    %cst_50 = arith.constant 2.500000e-01 : f32
    %128 = vector.broadcast %cst_50 : f32 to vector<8x128xf32>
    %129 = arith.mulf %128, %97 : vector<8x128xf32>
    %cst_51 = arith.constant 1.000000e+00 : f32
    %130 = vector.broadcast %cst_51 : f32 to vector<8x128xf32>
    %131 = arith.subf %130, %97 : vector<8x128xf32>
    %cst_52 = arith.constant 7.500000e-01 : f32
    %132 = vector.broadcast %cst_52 : f32 to vector<8x128xf32>
    %133 = arith.mulf %132, %131 : vector<8x128xf32>
    %134 = arith.addf %129, %133 : vector<8x128xf32>
    %c20_i32 = arith.constant 20 : i32
    %135 = vector.broadcast %c20_i32 : i32 to vector<8x128xi32>
    %136 = arith.cmpi slt, %72, %135 : vector<8x128xi32>
    %137 = arith.extui %136 : vector<8x128xi1> to vector<8x128xi32>
    %138 = arith.sitofp %137 : vector<8x128xi32> to vector<8x128xf32>
    %139 = arith.mulf %134, %118 : vector<8x128xf32>
    %140 = arith.mulf %127, %127 : vector<8x128xf32>
    %141 = arith.mulf %139, %140 : vector<8x128xf32>
    %142 = arith.mulf %141, %138 : vector<8x128xf32>
    %cst_53 = arith.constant dense<0.000000e+00> : vector<8xf32>
    %143 = vector.multi_reduction <add>, %142, %cst_53 [1] : vector<8x128xf32> to vector<8xf32>
    %144 = vector.shape_cast %143 : vector<8xf32> to vector<8x1xf32>
    %cst_54 = arith.constant dense<0.000000e+00> : vector<1xf32>
    %145 = vector.multi_reduction <add>, %144, %cst_54 [0] : vector<8x1xf32> to vector<1xf32>
    %146 = vector.shape_cast %145 : vector<1xf32> to vector<1x1xf32>
    %cst_55 = arith.constant 6.250000e-03 : f32
    %147 = vector.broadcast %cst_55 : f32 to vector<1x1xf32>
    %148 = arith.mulf %146, %147 : vector<1x1xf32>
    %149 = tpu.iota {dimensions = array<i32: 0>} : vector<8x128xi32>
    %150 = arith.mulf %71, %138 : vector<8x128xf32>
    %c0_i32 = arith.constant 0 : i32
    %151 = vector.broadcast %c0_i32 : i32 to vector<8x128xi32>
    %152 = arith.cmpi eq, %149, %151 : vector<8x128xi32>
    %c20_i32_56 = arith.constant 20 : i32
    %153 = vector.broadcast %c20_i32_56 : i32 to vector<8x128xi32>
    %154 = arith.cmpi eq, %72, %153 : vector<8x128xi32>
    %155 = arith.andi %152, %154 : vector<8x128xi1>
    %156 = vector.shape_cast %148 : vector<1x1xf32> to vector<1x1xf32>
    %157 = vector.broadcast %156 : vector<1x1xf32> to vector<8x128xf32>
    %158 = arith.select %155, %157, %150 : vector<8x128xi1>, vector<8x128xf32>
    %c0_57 = arith.constant 0 : index
    %c0_58 = arith.constant 0 : index
    %159 = vector.load %arg10[%c0_57, %c0_58] : memref<8x128xf32, #tpu.memory_space<vmem>>, vector<8x128xf32>
    tpu.vector_store %arg10[%c0_57, %c0_58], %158 {strides = array<i32>} : memref<8x128xf32, #tpu.memory_space<vmem>>, vector<8x128xf32>,
    return
  }
}

</mosaic_0001>

<bundles_post_ra>
// kernel: forward_on_gt_only.1
= control target key start
LH: loop header
LB: loop body
LE: loop exit
PB: predicated region body
PF: predicated region fallthrough
CT: control target
= control target key end

     0   :  { %v3288_v1 = vmov 0   ;;  %vm1817_vm0 = vcmask 1043456   ;;  %vm3289_vm1 = vmmov 1   ;;  %vm1813_vm3 = vcmask 97280   ;;  %s4620_s4 = inlined_call_operand.vmem [shape: bf16[768,128], index: 4, kind: input, shape index: {}]   ;;  %s4621_s5 = inlined_call_operand.vmem [shape: bf16[256,768], index: 5, kind: input, shape index: {}]   ;;  %s4622_s1 = inlined_call_operand.vmem [shape: f32[8,256], index: 1, kind: input, shape index: {}]   ;;  %s4623_s0 = inlined_call_operand.vmem [shape: f32[8,256], index: 0, kind: input, shape index: {}]   ;;  %s4624_s6 = inlined_call_operand.vmem [shape: f32[256,1], index: 6, kind: input, shape index: {}]   ;;  %s4625_s7 = inlined_call_operand.vmem [shape: f32[12,256], index: 7, kind: input, shape index: {}]   ;;  %s4626_s9 = inlined_call_operand.vmem [shape: f32[256,512], index: 9, kind: input, shape index: {}]   ;;  %s4627_s2 = inlined_call_operand.vmem [shape: f32[8,12], index: 2, kind: input, shape index: {}]   ;;  %s4628_s8 = inlined_call_operand.vmem [shape: f32[1,256], index: 8, kind: input, shape index: {}]   ;;  %s4629_s3 = inlined_call_operand.vmem [shape: s32[8,4], index: 3, kind: input, shape index: {}]   ;;  %s4630_s10 = inlined_call_operand.vmem [shape: f32[8,128], index: 10, kind: output, shape index: {}]  }
   0x1   :  { %v3076_v0 = vld [vmem:[%s4620_s4 + $0x40] sm:$0xff]   ;;  %3072 = vset.pattern.permute.xlu0 %v3288_v1  ;;  %3071 = vset.pattern.permute.xlu1 %v3288_v1  ;;  %v3080_v5 = vld [vmem:[%s4620_s4 + $0x48] sm:$0xff]   ;;  %v3084_v9 = vld [vmem:[%s4620_s4 + $0x50] sm:$0xff]  }
   0x2   :  { %v3077_v2 = vld [vmem:[%s4620_s4 + $0xc0] sm:$0xff]   ;;  %2512 = vmatprep.subr.bf16.mxu0 %v3076_v0  ;;  %v3081_v6 = vld [vmem:[%s4620_s4 + $0xc8] sm:$0xff]   ;;  %v3085_v10 = vld [vmem:[%s4620_s4 + $0xd0] sm:$0xff]  }
   0x3   :  { %v3078_v3 = vld [vmem:[%s4620_s4] sm:$0xff]   ;;  %2624 = vmatprep.subr.bf16.mxu1 %v3077_v2  ;;  %v3082_v7 = vld [vmem:[%s4620_s4 + $0x8] sm:$0xff]   ;;  %v3086_v11 = vld [vmem:[%s4620_s4 + $0x10] sm:$0xff]  }
   0x4   :  { %v3079_v4 = vld [vmem:[%s4620_s4 + $0x80] sm:$0xff]   ;;  %2513 = vmatpush3.bf16.msra.mxu0 %v3078_v3  ;;  %v3083_v8 = vld [vmem:[%s4620_s4 + $0x88] sm:$0xff]   ;;  %v3087_v12 = vld [vmem:[%s4620_s4 + $0x90] sm:$0xff]  }
   0x5   :  { %2625 = vmatpush3.bf16.msra.mxu1 %v3079_v4  ;;  %2514 = vmatprep.subr.bf16.mxu0 %v3080_v5  ;;  %v3088_v13 = vld [vmem:[%s4620_s4 + $0x58] sm:$0xff]   ;;  %v3092_v17 = vld [vmem:[%s4620_s4 + $0x60] sm:$0xff]   ;;  %v3096_v21 = vld [vmem:[%s4620_s4 + $0x68] sm:$0xff]  }
   0x6   :  { %2626 = vmatprep.subr.bf16.mxu1 %v3081_v6  ;;  %v3089_v14 = vld [vmem:[%s4620_s4 + $0xd8] sm:$0xff]   ;;  %v3093_v18 = vld [vmem:[%s4620_s4 + $0xe0] sm:$0xff]   ;;  %v3097_v22 = vld [vmem:[%s4620_s4 + $0xe8] sm:$0xff]  }
   0x7   :  { %v3090_v15 = vld [vmem:[%s4620_s4 + $0x18] sm:$0xff]   ;;  %v3094_v19 = vld [vmem:[%s4620_s4 + $0x20] sm:$0xff]   ;;  %v3098_v23 = vld [vmem:[%s4620_s4 + $0x28] sm:$0xff]  }
   0x8   :  { %2515 = vmatpush3.bf16.msra.mxu0 %v3082_v7  ;;  %v3091_v16 = vld [vmem:[%s4620_s4 + $0x98] sm:$0xff]   ;;  %v3095_v20 = vld [vmem:[%s4620_s4 + $0xa0] sm:$0xff]   ;;  %v3099_v24 = vld [vmem:[%s4620_s4 + $0xa8] sm:$0xff]  }
   0x9   :  { %2627 = vmatpush3.bf16.msra.mxu1 %v3083_v8  ;;  %2516 = vmatprep.subr.bf16.mxu0 %v3084_v9  ;;  %v3100_v25 = vld [vmem:[%s4620_s4 + $0x70] sm:$0xff]   ;;  %v3104_v29 = vld [vmem:[%s4620_s4 + $0x78] sm:$0xff]   ;;  %v3111_v35 = vld [vmem:[%s4621_s5 + $0x8] ss:$24 sps:$4 sm:$0xff]  }
   0xa   :  { %2628 = vmatprep.subr.bf16.mxu1 %v3085_v10  ;;  %v3101_v26 = vld [vmem:[%s4620_s4 + $0xf0] sm:$0xff]   ;;  %v3105_v30 = vld [vmem:[%s4620_s4 + $0xf8] sm:$0xff]   ;;  %v3113_v36 = vld [vmem:[%s4621_s5 + $0xc] ss:$24 sps:$4 sm:$0xff]  }
   0xb   :  { %v3102_v27 = vld [vmem:[%s4620_s4 + $0x30] sm:$0xff]   ;;  %v3106_v31 = vld [vmem:[%s4620_s4 + $0x38] sm:$0xff]   ;;  %v3114_v37 = vld [vmem:[%s4620_s4 + $0x140] sm:$0xff]   ;;  %1381 = vmatprep.mubr.bf16.mxu1 %v3113_v36 }
   0xc   :  { %2517 = vmatpush3.bf16.msra.mxu0 %v3086_v11  ;;  %v3103_v28 = vld [vmem:[%s4620_s4 + $0xb0] sm:$0xff]   ;;  %v3107_v32 = vld [vmem:[%s4620_s4 + $0xb8] sm:$0xff]   ;;  %v3115_v38 = vld [vmem:[%s4620_s4 + $0x100] sm:$0xff]  }
   0xd   :  { %2629 = vmatpush3.bf16.msra.mxu1 %v3087_v12  ;;  %2518 = vmatprep.subr.bf16.mxu0 %v3088_v13  ;;  %v3108_v33 = vld [vmem:[%s4621_s5] ss:$24 sps:$4 sm:$0xff]   ;;  %v3110_v34 = vld [vmem:[%s4621_s5 + $0x4] ss:$24 sps:$4 sm:$0xff]   ;;  %v3116_v39 = vld [vmem:[%s4621_s5 + $0x34] ss:$24 sps:$4 sm:$0xff]  }
   0xe   :  { %2630 = vmatprep.subr.bf16.mxu1 %v3089_v14  ;;  %1220 = vmatprep.mubr.bf16.mxu0 %v3110_v34  ;;  %v3118_v40 = vld [vmem:[%s4621_s5 + $0x3c] ss:$24 sps:$4 sm:$0xff]   ;;  %v3120_v41 = vld [vmem:[%s4621_s5 + $0x30] ss:$24 sps:$4 sm:$0xff]   ;;  %v3124_v44 = vld [vmem:[%s4621_s5 + $0x6c] ss:$24 sps:$4 sm:$0xff]  }
   0xf   :  { %v3121_v42 = vld [vmem:[%s4621_s5 + $0x38] ss:$24 sps:$4 sm:$0xff]   ;;  %v3122_v43 = vld [vmem:[%s4621_s5 + $0x64] ss:$24 sps:$4 sm:$0xff]   ;;  %v3128_v45 = vld [vmem:[%s4620_s4 + $0x148] sm:$0xff]  }
  0x10   :  { %2519 = vmatpush3.bf16.msra.mxu0 %v3090_v15  ;;  %v3129_v46 = vld [vmem:[%s4620_s4 + $0x108] sm:$0xff]   ;;  %v3126_v47 = vld [vmem:[%s4621_s5 + $0x60] ss:$24 sps:$4 sm:$0xff]   ;;  %v3132_v50 = vld [vmem:[%s4621_s5 + $0x9c] ss:$24 sps:$4 sm:$0xff]  }
  0x11   :  { %2631 = vmatpush3.bf16.msra.mxu1 %v3091_v16  ;;  %2520 = vmatprep.subr.bf16.mxu0 %v3092_v17  ;;  %v3127_v48 = vld [vmem:[%s4621_s5 + $0x68] ss:$24 sps:$4 sm:$0xff]   ;;  %v3130_v49 = vld [vmem:[%s4621_s5 + $0x94] ss:$24 sps:$4 sm:$0xff]   ;;  %v3135_v54 = vld [vmem:[%s4621_s5 + $0x98] ss:$24 sps:$4 sm:$0xff]  }
  0x12   :  { %2632 = vmatprep.subr.bf16.mxu1 %v3093_v18  ;;  %v3142_v51 = vld [vmem:[%s4620_s4 + $0x150] sm:$0xff]   ;;  %v3136_v55 = vld [vmem:[%s4621_s5 + $0xc4] ss:$24 sps:$4 sm:$0xff]   ;;  %v3140_v59 = vld [vmem:[%s4621_s5 + $0xc0] ss:$24 sps:$4 sm:$0xff]  }
  0x13   :  { %v3143_v52 = vld [vmem:[%s4620_s4 + $0x110] sm:$0xff]   ;;  %v3138_v56 = vld [vmem:[%s4621_s5 + $0xcc] ss:$24 sps:$4 sm:$0xff]   ;;  %v3156_v57 = vld [vmem:[%s4620_s4 + $0x158] sm:$0xff]  }
  0x14   :  { %2521 = vmatpush3.bf16.msra.mxu0 %v3094_v19  ;;  %v3134_v53 = vld [vmem:[%s4621_s5 + $0x90] ss:$24 sps:$4 sm:$0xff]   ;;  %v3157_v58 = vld [vmem:[%s4620_s4 + $0x118] sm:$0xff]   ;;  %v1785_v61 = vld [vmem:[%s4622_s1] sm:$0xff] }
  0x15   :  { %2633 = vmatpush3.bf16.msra.mxu1 %v3095_v20  ;;  %2522 = vmatprep.subr.bf16.mxu0 %v3096_v21  ;;  %v3141_v60 = vld [vmem:[%s4621_s5 + $0xc8] ss:$24 sps:$4 sm:$0xff]   ;;  %v3144_v63 = vld [vmem:[%s4621_s5 + $0xf4] ss:$24 sps:$4 sm:$0xff]   ;;  %v1787_v1 = vmul.f32 %v1785_v61, %v1785_v61  ;;  %v3149_v11 = vld [vmem:[%s4621_s5 + $0xf8] ss:$24 sps:$4 sm:$0xff]  }
  0x16   :  { %2634 = vmatprep.subr.bf16.mxu1 %v3097_v22  ;;  %v1786_v62 = vld [vmem:[%s4622_s1 + $0x8] sm:$0xff]  ;;  %v3146_v0 = vld [vmem:[%s4621_s5 + $0xfc] ss:$24 sps:$4 sm:$0xff]   ;;  %v3170_v3 = vld [vmem:[%s4620_s4 + $0x160] sm:$0xff]  }
  0x17   :  { %v1788_v2 = vmul.f32 %v1786_v62, %v1786_v62  ;;  %v3171_v5 = vld [vmem:[%s4620_s4 + $0x120] sm:$0xff]   ;;  %v1775_v7 = vld [vmem:[%s4623_s0 + $0x8] sm:$0xff]  ;;  %v3160_v20 = vld [vmem:[%s4621_s5 + $0x15c] ss:$24 sps:$4 sm:$0xff]  }
  0x18   :  { %2523 = vmatpush3.bf16.msra.mxu0 %v3098_v23  ;;  %v1774_v6 = vld [vmem:[%s4623_s0] sm:$0xff]  ;;  %v1777_v9 = vmul.f32 %v1775_v7, %v1775_v7  ;;  %v3148_v10 = vld [vmem:[%s4621_s5 + $0xf0] ss:$24 sps:$4 sm:$0xff]   ;;  %v3158_v19 = vld [vmem:[%s4621_s5 + $0x154] ss:$24 sps:$4 sm:$0xff]  }
  0x19   :  { %2635 = vmatpush3.bf16.msra.mxu1 %v3099_v24  ;;  %2524 = vmatprep.subr.bf16.mxu0 %v3100_v25  ;;  %v1789_v4 = vadd.f32 %v1788_v2, %v1787_v1  ;;  %v1776_v8 = vmul.f32 %v1774_v6, %v1774_v6  ;;  %v3150_v12 = vld [vmem:[%s4621_s5 + $0x124] ss:$24 sps:$4 sm:$0xff]   ;;  %v3184_v14 = vld [vmem:[%s4620_s4 + $0x168] sm:$0xff]   ;;  %v3154_v17 = vld [vmem:[%s4621_s5 + $0x120] ss:$24 sps:$4 sm:$0xff]  }
  0x1a   :  { %2636 = vmatprep.subr.bf16.mxu1 %v3101_v26  ;;  %v3152_v15 = vld [vmem:[%s4621_s5 + $0x12c] ss:$24 sps:$4 sm:$0xff]   ;;  %v3155_v18 = vld [vmem:[%s4621_s5 + $0x128] ss:$24 sps:$4 sm:$0xff]   ;;  %v3198_v21 = vld [vmem:[%s4620_s4 + $0x170] sm:$0xff]  }
  0x1b   :  { %1790 = vadd.xlane.f32.xlu0 %v1789_v4  ;;  %v1778_v13 = vadd.f32 %v1777_v9, %v1776_v8  ;;  %v3185_v16 = vld [vmem:[%s4620_s4 + $0x128] sm:$0xff]   ;;  %v3199_v22 = vld [vmem:[%s4620_s4 + $0x130] sm:$0xff]   ;;  %v228_v25 = vld [vmem:[%s4624_s6] sm:$0xff] }
  0x1c   :  { %2525 = vmatpush3.bf16.msra.mxu0 %v3102_v27  ;;  %v3162_v23 = vld [vmem:[%s4621_s5 + $0x150] ss:$24 sps:$4 sm:$0xff]   ;;  %v3164_v27 = vld [vmem:[%s4621_s5 + $0x184] ss:$24 sps:$4 sm:$0xff]   ;;  %v3168_v34 = vld [vmem:[%s4621_s5 + $0x180] ss:$24 sps:$4 sm:$0xff]  }
  0x1d   :  { %2637 = vmatpush3.bf16.msra.mxu1 %v3103_v28  ;;  %2526 = vmatprep.subr.bf16.mxu0 %v3104_v29  ;;  %v3163_v24 = vld [vmem:[%s4621_s5 + $0x158] ss:$24 sps:$4 sm:$0xff]   ;;  %v3166_v28 = vld [vmem:[%s4621_s5 + $0x18c] ss:$24 sps:$4 sm:$0xff]   ;;  %v3169_v36 = vld [vmem:[%s4621_s5 + $0x188] ss:$24 sps:$4 sm:$0xff]  }
  0x1e   :  { %2638 = vmatprep.subr.bf16.mxu1 %v3105_v30  ;;  %1779 = vadd.xlane.f32.xlu1 %v1778_v13  ;;  %v230_v26 = vld [vmem:[%s4624_s6 + $0x10] sm:$0xff]  ;;  %v3212_v29 = vld [vmem:[%s4620_s4 + $0x178] sm:$0xff]   ;;  %v229_v30 = vld [vmem:[%s4624_s6 + $0x8] sm:$0xff] }
  0x1f   :  { %vm3649_vm2 = vmpackc.low %vm1817_vm0, %vm3289_vm1  ;;  %v3190_v61 = vld [vmem:[%s4621_s5 + $0x210] ss:$24 sps:$4 sm:$0xff]   ;;  %v3194_v2 = vld [vmem:[%s4621_s5 + $0x24c] ss:$24 sps:$4 sm:$0xff]  }
  0x20   :  { %2527 = vmatpush3.bf16.msra.mxu0 %v3106_v31  ;;  %v3213_v31 = vld [vmem:[%s4620_s4 + $0x138] sm:$0xff]   ;;  %v246_v1 = vld [vmem:[%s4624_s6 + $0x90] sm:$0xff]  ;;  %v248_v4 = vld [vmem:[%s4624_s6 + $0xa0] sm:$0xff] }
  0x21   :  { %2639 = vmatpush3.bf16.msra.mxu1 %v3107_v32  ;;  %2736 = vmatprep.subr.bf16.mxu0 %v3114_v37  ;;  %v231_v32 = vld [vmem:[%s4624_s6 + $0x18] sm:$0xff]  ;;  %v250_v7 = vld [vmem:[%s4624_s6 + $0xb0] sm:$0xff]  ;;  %v3197_v8 = vld [vmem:[%s4621_s5 + $0x248] ss:$24 sps:$4 sm:$0xff]  }
  0x22   :  { %3049 = vmatprep.subr.bf16.mxu1 %v3114_v37  ;;  %v3172_v37 = vld [vmem:[%s4621_s5 + $0x1b4] ss:$24 sps:$4 sm:$0xff]   ;;  %v3191_v62 = vld [vmem:[%s4621_s5 + $0x218] ss:$24 sps:$4 sm:$0xff]  }
  0x23   :  { %1221 = vmatmul.mubr.bf16.vlgmr.msra.gmra.mrb[0].mxu0 %v3108_v33  ;;  %v232_v33 = vld [vmem:[%s4624_s6 + $0x20] sm:$0xff]  ;;  %v3200_v9 = vld [vmem:[%s4621_s5 + $0x274] ss:$24 sps:$4 sm:$0xff]   ;;  %v3204_v13 = vld [vmem:[%s4621_s5 + $0x270] ss:$24 sps:$4 sm:$0xff]  }
  0x24   :  { %1382 = vmatmul.mubr.bf16.vlgmr.msra.gmra.mrb[0].mxu1 %v3111_v35  ;;  %1228 = vmatprep.mubr.bf16.mxu0 %v3116_v39  ;;  %v233_v35 = vld [vmem:[%s4624_s6 + $0x28] sm:$0xff]  ;;  %v3196_v6 = vld [vmem:[%s4621_s5 + $0x240] ss:$24 sps:$4 sm:$0xff]  }
  0x25   :  { %3057 = vmatpush3.bf16.msra.mxu1 %v3115_v38  ;;  %2737 = vmatpush3.bf16.msra.mxu0 %v3115_v38  ;;  %v3174_v38 = vld [vmem:[%s4621_s5 + $0x1bc] ss:$24 sps:$4 sm:$0xff]   ;;  %v1798_v39 = vld [vmem:[%s4625_s7 + $0x8] sm:$0xff] }
  0x26   :  { %1389 = vmatprep.mubr.bf16.mxu1 %v3118_v40  ;;  %3050 = vmatprep.subr.bf16.mxu1 %v3128_v45  ;;  %v1800_v40 = vld [vmem:[%s4625_s7 + $0x18] sm:$0xf] }
  0x27   :  { %2738 = vmatprep.subr.bf16.mxu0 %v3128_v45  ;;  %v235_v45 = vld [vmem:[%s4624_s6 + $0x38] sm:$0xff] }
  0x29   :  { %3058 = vmatpush3.bf16.msra.mxu1 %v3129_v46  ;;  %2739 = vmatpush3.bf16.msra.mxu0 %v3129_v46  ;;  %v3176_v46 = vld [vmem:[%s4621_s5 + $0x1b0] ss:$24 sps:$4 sm:$0xff]  }
  0x2a   :  { %3051 = vmatprep.subr.bf16.mxu1 %v3142_v51  ;;  %2740 = vmatprep.subr.bf16.mxu0 %v3142_v51  ;;  %v237_v51 = vld [vmem:[%s4624_s6 + $0x48] sm:$0xff] }
  0x2b   :  { %1229 = vmatmul.mubr.bf16.gmra.mrb[4].mxu0 %v3120_v41  ;;  %v234_v41 = vld [vmem:[%s4624_s6 + $0x30] sm:$0xff] }
  0x2c   :  { %1390 = vmatmul.mubr.bf16.gmra.mrb[4].mxu1 %v3121_v42  ;;  %1236 = vmatprep.mubr.bf16.mxu0 %v3122_v43  ;;  %v236_v42 = vld [vmem:[%s4624_s6 + $0x40] sm:$0xff]  ;;  %v2883_v43 = vpack.c.bf16 %v1800_v40, %v1798_v39  ;;  %v1899_v39 = vld [vmem:[%s4626_s9 + $0x10] sm:$0xff] }
  0x2d   :  { %1397 = vmatprep.mubr.bf16.mxu1 %v3124_v44  ;;  %3059 = vmatpush3.bf16.msra.mxu1 %v3143_v52  ;;  %v1903_v40 = vld [vmem:[%s4626_s9 + $0x30] sm:$0xff]  ;;  %v1908_v44 = vld [vmem:[%s4626_s9 + $0x58] sm:$0xff] }
  0x2e   :  { %2741 = vmatpush3.bf16.msra.mxu0 %v3143_v52  ;;  %3052 = vmatprep.subr.bf16.mxu1 %v3156_v57  ;;  %v240_v52 = vld [vmem:[%s4624_s6 + $0x60] sm:$0xff] }
  0x2f   :  { %2742 = vmatprep.subr.bf16.mxu0 %v3156_v57  ;;  %272 = vperm.xlu1 %3071, %v230_v26   ;;  %v3186_v57 = vld [vmem:[%s4621_s5 + $0x214] ss:$24 sps:$4 sm:$0xff]   ;;  %v3219_v26 = vld [vmem:[%s4621_s5 + $0x2d8] ss:$24 sps:$4 sm:$0xff]  }
  0x31   :  { %3060 = vmatpush3.bf16.msra.mxu1 %v3157_v58  ;;  %262 = vperm.xlu0 %3072, %v228_v25   ;;  %v3218_v25 = vld [vmem:[%s4621_s5 + $0x2d0] ss:$24 sps:$4 sm:$0xff]  }
  0x32   :  { %2743 = vmatpush3.bf16.msra.mxu0 %v3157_v58  ;;  %3053 = vmatprep.subr.bf16.mxu1 %v3170_v3  ;;  %v3188_v58 = vld [vmem:[%s4621_s5 + $0x21c] ss:$24 sps:$4 sm:$0xff]  }
  0x33   :  { %1237 = vmatmul.mubr.bf16.gmra.mrb[8].mxu0 %v3126_v47  ;;  %2744 = vmatprep.subr.bf16.mxu0 %v3170_v3  ;;  %v238_v47 = vld [vmem:[%s4624_s6 + $0x50] sm:$0xff]  ;;  %v245_v3 = vld [vmem:[%s4624_s6 + $0x88] sm:$0xff] }
  0x34   :  { %1398 = vmatmul.mubr.bf16.gmra.mrb[8].mxu1 %v3127_v48  ;;  %1244 = vmatprep.mubr.bf16.mxu0 %v3130_v49  ;;  %v3177_v48 = vld [vmem:[%s4621_s5 + $0x1b8] ss:$24 sps:$4 sm:$0xff]   ;;  %v3178_v49 = vld [vmem:[%s4621_s5 + $0x1e4] ss:$24 sps:$4 sm:$0xff]  }
  0x35   :  { %1405 = vmatprep.mubr.bf16.mxu1 %v3132_v50  ;;  %3061 = vmatpush3.bf16.msra.mxu1 %v3171_v5  ;;  %v3180_v50 = vld [vmem:[%s4621_s5 + $0x1ec] ss:$24 sps:$4 sm:$0xff]  }
  0x36   :  { %2745 = vmatpush3.bf16.msra.mxu0 %v3171_v5  ;;  %3054 = vmatprep.subr.bf16.mxu1 %v3184_v14  ;;  %v247_v5 = vld [vmem:[%s4624_s6 + $0x98] sm:$0xff] }
  0x37   :  { %2746 = vmatprep.subr.bf16.mxu0 %v3184_v14  ;;  %267 = vperm.xlu0 %3072, %v229_v30   ;;  %v3205_v14 = vld [vmem:[%s4621_s5 + $0x278] ss:$24 sps:$4 sm:$0xff]  }
  0x38   :  { %277 = vperm.xlu1 %3071, %v231_v32   ;;  %v1799_v30 = vld [vmem:[%s4625_s7 + $0x10] sm:$0xf] }
  0x39   :  { %3062 = vmatpush3.bf16.msra.mxu1 %v3185_v16  ;;  %v3223_v32 = vld [vmem:[%s4621_s5 + $0x2b0] ss:$24 sps:$4 sm:$0xff]  }
  0x3a   :  { %2747 = vmatpush3.bf16.msra.mxu0 %v3185_v16  ;;  %3055 = vmatprep.subr.bf16.mxu1 %v3198_v21  ;;  %v3208_v16 = vld [vmem:[%s4621_s5 + $0x2ac] ss:$24 sps:$4 sm:$0xff]  }
  0x3b   :  { %1245 = vmatmul.mubr.bf16.gmra.mrb[12].mxu0 %v3134_v53  ;;  %2748 = vmatprep.subr.bf16.mxu0 %v3198_v21  ;;  %v3182_v53 = vld [vmem:[%s4621_s5 + $0x1e0] ss:$24 sps:$4 sm:$0xff]   ;;  %v3214_v21 = vld [vmem:[%s4621_s5 + $0x2d4] ss:$24 sps:$4 sm:$0xff]  }
  0x3c   :  { %1406 = vmatmul.mubr.bf16.gmra.mrb[12].mxu1 %v3135_v54  ;;  %1252 = vmatprep.mubr.bf16.mxu0 %v3136_v55  ;;  %v239_v54 = vld [vmem:[%s4624_s6 + $0x58] sm:$0xff]  ;;  %v242_v55 = vld [vmem:[%s4624_s6 + $0x70] sm:$0xff] }
  0x3d   :  { %1413 = vmatprep.mubr.bf16.mxu1 %v3138_v56  ;;  %3063 = vmatpush3.bf16.msra.mxu1 %v3199_v22  ;;  %v3183_v56 = vld [vmem:[%s4621_s5 + $0x1e8] ss:$24 sps:$4 sm:$0xff]  }
  0x3e   :  { %2749 = vmatpush3.bf16.msra.mxu0 %v3199_v22  ;;  %3056 = vmatprep.subr.bf16.mxu1 %v3212_v29  ;;  %v3216_v22 = vld [vmem:[%s4621_s5 + $0x2dc] ss:$24 sps:$4 sm:$0xff]  }
  0x3f   :  { %2750 = vmatprep.subr.bf16.mxu0 %v3212_v29  ;;  %282 = vperm.xlu0 %3072, %v232_v33   ;;  %v1797_v29 = vld [vmem:[%s4625_s7] sm:$0xff] }
  0x40   :  { %287 = vperm.xlu1 %3071, %v233_v35   ;;  %v3226_v33 = vld [vmem:[%s4621_s5 + $0x44] ss:$24 sps:$4 sm:$0xff]  }
  0x41   :  { %3064 = vmatpush3.bf16.msra.mxu1 %v3213_v31  ;;  %v3228_v35 = vld [vmem:[%s4621_s5 + $0x2e4] ss:$24 sps:$4 sm:$0xff]  }
  0x42   :  { %2751 = vmatpush3.bf16.msra.mxu0 %v3213_v31  ;;  %2885 = vmatprep.subr.msk.bf16.mxu1 %vm3649_vm2, %v2883_v43  ;;  %v3220_v31 = vld [vmem:[%s4621_s5 + $0x10] ss:$24 sps:$4 sm:$0xff]   ;;  %v3231_v43 = vld [vmem:[%s4621_s5 + $0x2e0] ss:$24 sps:$4 sm:$0xff]  }
  0x43   :  { %1253 = vmatmul.mubr.bf16.gmra.mrb[16].mxu0 %v3140_v59  ;;  %292 = vperm.xlu0 %3072, %v234_v41   ;;  %v241_v59 = vld [vmem:[%s4624_s6 + $0x68] sm:$0xff]  ;;  %v2955_v41 = vpack.c.bf16 %v1903_v40, %v1899_v39  ;;  %v1909_v39 = vld [vmem:[%s4626_s9 + $0x60] sm:$0xff] }
  0x44   :  { %1414 = vmatmul.mubr.bf16.gmra.mrb[16].mxu1 %v3141_v60  ;;  %1260 = vmatprep.mubr.bf16.mxu0 %v3144_v63  ;;  %v244_v60 = vld [vmem:[%s4624_s6 + $0x80] sm:$0xff]  ;;  %v243_v63 = vld [vmem:[%s4624_s6 + $0x78] sm:$0xff] }
  0x45   :  { %1421 = vmatprep.mubr.bf16.mxu1 %v3146_v0  ;;  %302 = vperm.xlu1 %3071, %v236_v42   ;;  %v3192_v0 = vld [vmem:[%s4621_s5 + $0x244] ss:$24 sps:$4 sm:$0xff]   ;;  %v3230_v42 = vld [vmem:[%s4621_s5 + $0x40] ss:$24 sps:$4 sm:$0xff]  }
  0x47   :  { %297 = vperm.xlu0 %3072, %v235_v45   ;;  %v3232_v45 = vld [vmem:[%s4621_s5 + $0x74] ss:$24 sps:$4 sm:$0xff]  }
  0x49   :  { %312 = vperm.xlu1 %3071, %v238_v47   ;;  %v1907_v47 = vld [vmem:[%s4626_s9 + $0x50] sm:$0xff] }
  0x4b   :  { %1261 = vmatmul.mubr.bf16.gmra.mrb[20].mxu0 %v3148_v10  ;;  %307 = vperm.xlu0 %3072, %v237_v51   ;;  %v3202_v10 = vld [vmem:[%s4621_s5 + $0x27c] ss:$24 sps:$4 sm:$0xff]   ;;  %v4631_v51 = vmov 0.0  }
  0x4c   :  { %1422 = vmatmul.mubr.bf16.gmra.mrb[20].mxu1 %v3149_v11  ;;  %1268 = vmatprep.mubr.bf16.mxu0 %v3150_v12  ;;  %v249_v11 = vld [vmem:[%s4624_s6 + $0xa8] sm:$0xff]  ;;  %v251_v12 = vld [vmem:[%s4624_s6 + $0xb8] sm:$0xff] }
  0x4d   :  { %1429 = vmatprep.mubr.bf16.mxu1 %v3152_v15  ;;  %322 = vperm.xlu1 %3071, %v240_v52   ;;  %v3206_v15 = vld [vmem:[%s4621_s5 + $0x2a4] ss:$24 sps:$4 sm:$0xff]   ;;  %v3234_v52 = vld [vmem:[%s4621_s5 + $0x70] ss:$24 sps:$4 sm:$0xff]  }
  0x4f   :  { %317 = vperm.xlu0 %3072, %v239_v54   ;;  %v1920_v54 = vld [vmem:[%s4626_s9 + $0xb8] sm:$0xff] }
  0x51   :  { %332 = vperm.xlu1 %3071, %v242_v55   ;;  %v3235_v55 = vld [vmem:[%s4621_s5 + $0xa4] ss:$24 sps:$4 sm:$0xff]  }
  0x53   :  { %1269 = vmatmul.mubr.bf16.gmra.mrb[24].mxu0 %v3154_v17  ;;  %327 = vperm.xlu0 %3072, %v241_v59   ;;  %v253_v17 = vld [vmem:[%s4624_s6 + $0xc8] sm:$0xff]  ;;  %v1919_v59 = vld [vmem:[%s4626_s9 + $0xb0] sm:$0xff] }
  0x54   :  { %1430 = vmatmul.mubr.bf16.gmra.mrb[24].mxu1 %v3155_v18  ;;  %1276 = vmatprep.mubr.bf16.mxu0 %v3158_v19  ;;  %v255_v18 = vld [vmem:[%s4624_s6 + $0xd8] sm:$0xff] }
  0x55   :  { %1437 = vmatprep.mubr.bf16.mxu1 %v3160_v20  ;;  %342 = vperm.xlu1 %3071, %v244_v60   ;;  %v3210_v19 = vld [vmem:[%s4621_s5 + $0x2a0] ss:$24 sps:$4 sm:$0xff]  }
  0x56   :  { %v3211_v20 = vld [vmem:[%s4621_s5 + $0x2a8] ss:$24 sps:$4 sm:$0xff]  }
  0x57   :  { %337 = vperm.xlu0 %3072, %v243_v63   ;;  %v3237_v63 = vld [vmem:[%s4621_s5 + $0xa0] ss:$24 sps:$4 sm:$0xff]  }
  0x59   :  { %352 = vperm.xlu1 %3071, %v246_v1   ;;  %v1923_v1 = vld [vmem:[%s4626_s9 + $0xd0] sm:$0xff] }
  0x5b   :  { %1277 = vmatmul.mubr.bf16.gmra.mrb[28].mxu0 %v3162_v23  ;;  %347 = vperm.xlu0 %3072, %v245_v3   ;;  %v257_v23 = vld [vmem:[%s4624_s6 + $0xe8] sm:$0xff] }
  0x5c   :  { %1438 = vmatmul.mubr.bf16.gmra.mrb[28].mxu1 %v3163_v24  ;;  %1284 = vmatprep.mubr.bf16.mxu0 %v3164_v27  ;;  %v259_v24 = vld [vmem:[%s4624_s6 + $0xf8] sm:$0xff]  ;;  %v3222_v27 = vld [vmem:[%s4621_s5 + $0x14] ss:$24 sps:$4 sm:$0xff]  }
  0x5d   :  { %1445 = vmatprep.mubr.bf16.mxu1 %v3166_v28  ;;  %362 = vperm.xlu1 %3071, %v248_v4   ;;  %v3225_v28 = vld [vmem:[%s4621_s5 + $0x2b4] ss:$24 sps:$4 sm:$0xff]  }
  0x5e   :  { %v3238_v3 = vld [vmem:[%s4621_s5 + $0xd4] ss:$24 sps:$4 sm:$0xff]  }
  0x5f   :  { %357 = vperm.xlu0 %3072, %v247_v5   ;;  %v1932_v5 = vld [vmem:[%s4626_s9 + $0x118] sm:$0xff] }
  0x61   :  { %372 = vperm.xlu1 %3071, %v250_v7   ;;  %v1931_v7 = vld [vmem:[%s4626_s9 + $0x110] sm:$0xff] }
  0x63   :  { %1285 = vmatmul.mubr.bf16.gmra.mrb[32].mxu0 %v3168_v34  ;;  %367 = vperm.xlu0 %3072, %v249_v11   ;;  %v2886_v34 = vpack.c.bf16 %v1799_v30, %v1797_v29  ;;  %v3241_v11 = vld [vmem:[%s4621_s5 + $0x104] ss:$24 sps:$4 sm:$0xff]  }
  0x64   :  { %1446 = vmatmul.mubr.bf16.gmra.mrb[32].mxu1 %v3169_v36  ;;  %1292 = vmatprep.mubr.bf16.mxu0 %v3172_v37  ;;  %v1900_v36 = vld [vmem:[%s4626_s9 + $0x18] sm:$0xff]  ;;  %v1897_v29 = vld [vmem:[%s4626_s9] sm:$0xff] }
  0x65   :  { %1453 = vmatprep.mubr.bf16.mxu1 %v3174_v38  ;;  %v1904_v37 = vld [vmem:[%s4626_s9 + $0x38] sm:$0xff]  ;;  %v1901_v30 = vld [vmem:[%s4626_s9 + $0x20] sm:$0xff] }
  0x66   :  { %v2953_v38 = vpack.c.bf16 %v1904_v37, %v1900_v36  ;;  %v3247_v36 = vld [vmem:[%s4621_s5 + $0x164] ss:$24 sps:$4 sm:$0xff]  }
  0x67   :  { %377 = vperm.xlu0 %3072, %v251_v12  }
  0x68   :  { %2954 = vmatprep.subr.bf16.mxu0 %v2953_v38  ;;  %v1905_v38 = vld [vmem:[%s4626_s9 + $0x40] sm:$0xff] }
  0x69   :  { %v2895_v40 = vpack.c.bf16 %v1909_v39, %v1905_v38  ;;  %v1957_v38 = vld [vmem:[%s4626_s9 + $0x1e0] sm:$0xff]  ;;  %v1979_v39 = vld [vmem:[%s4626_s9 + $0x290] sm:$0xff] }
  0x6b   :  { %1293 = vmatmul.mubr.bf16.gmra.mrb[36].mxu0 %v3176_v46  ;;  %387 = vperm.xlu0 %3072, %v253_v17   ;;  %v1912_v46 = vld [vmem:[%s4626_s9 + $0x78] sm:$0xff]  ;;  %v1943_v17 = vld [vmem:[%s4626_s9 + $0x170] sm:$0xff] }
  0x6c   :  { %1454 = vmatmul.mubr.bf16.gmra.mrb[36].mxu1 %v3177_v48  ;;  %1300 = vmatprep.mubr.bf16.mxu0 %v3178_v49  ;;  %v2957_v48 = vpack.c.bf16 %v1912_v46, %v1908_v44  ;;  %v1911_v49 = vld [vmem:[%s4626_s9 + $0x70] sm:$0xff] }
  0x6d   :  { %1461 = vmatprep.mubr.bf16.mxu1 %v3180_v50  ;;  %v2959_v50 = vpack.c.bf16 %v1911_v49, %v1907_v47  ;;  %v1955_v44 = vld [vmem:[%s4626_s9 + $0x1d0] sm:$0xff]  ;;  %v1918_v47 = vld [vmem:[%s4626_s9 + $0xa8] sm:$0xff] }
  0x6e   :  { %v1959_v46 = vld [vmem:[%s4626_s9 + $0x1f0] sm:$0xff] }
  0x6f   :  { %397 = vperm.xlu0 %3072, %v255_v18   ;;  %v3243_v18 = vld [vmem:[%s4621_s5 + $0x100] ss:$24 sps:$4 sm:$0xff]  }
  0x73   :  { %1301 = vmatmul.mubr.bf16.gmra.mrb[40].mxu0 %v3182_v53  ;;  %407 = vperm.xlu0 %3072, %v257_v23   ;;  %v1916_v53 = vld [vmem:[%s4626_s9 + $0x98] sm:$0xff] }
  0x74   :  { %1462 = vmatmul.mubr.bf16.gmra.mrb[40].mxu1 %v3183_v56  ;;  %1308 = vmatprep.mubr.bf16.mxu0 %v3186_v57  ;;  %v2961_v56 = vpack.c.bf16 %v1920_v54, %v1916_v53  ;;  %v1796_v57 = vld [vmem:[%s4627_s2] sm:$0xff]  ;;  %v1948_v23 = vld [vmem:[%s4626_s9 + $0x198] sm:$0xff] }
  0x75   :  { %1469 = vmatprep.mubr.bf16.mxu1 %v3188_v58  ;;  %v1915_v58 = vld [vmem:[%s4626_s9 + $0x90] sm:$0xff]  ;;  %v3249_v54 = vld [vmem:[%s4621_s5 + $0x160] ss:$24 sps:$4 sm:$0xff]  }
  0x76   :  { %v2963_v60 = vpack.c.bf16 %v1919_v59, %v1915_v58  ;;  %v1921_v59 = vld [vmem:[%s4626_s9 + $0xc0] sm:$0xff] }
  0x77   :  { %417 = vperm.xlu0 %3072, %v259_v24   ;;  %v1952_v24 = vld [vmem:[%s4626_s9 + $0x1b8] sm:$0xff] }
  0x7b   :  { %1309 = vmatmul.mubr.bf16.gmra.mrb[44].mxu0 %v3190_v61  ;;  %v1924_v61 = vld [vmem:[%s4626_s9 + $0xd8] sm:$0xff] }
  0x7c   :  { %1470 = vmatmul.mubr.bf16.gmra.mrb[44].mxu1 %v3191_v62  ;;  %1316 = vmatprep.mubr.bf16.mxu0 %v3192_v0  ;;  %v1928_v62 = vld [vmem:[%s4626_s9 + $0xf8] sm:$0xff] }
  0x7d   :  { %1477 = vmatprep.mubr.bf16.mxu1 %v3194_v2  ;;  %v2965_v0 = vpack.c.bf16 %v1928_v62, %v1924_v61  ;;  %v1927_v2 = vld [vmem:[%s4626_s9 + $0xf0] sm:$0xff]  ;;  %v1964_v61 = vld [vmem:[%s4626_s9 + $0x218] sm:$0xff] }
  0x7e   :  { %v2967_v4 = vpack.c.bf16 %v1927_v2, %v1923_v1  ;;  %v1968_v62 = vld [vmem:[%s4626_s9 + $0x238] sm:$0xff]  ;;  %v1963_v1 = vld [vmem:[%s4626_s9 + $0x210] sm:$0xff] }
  0x7f   :  { %v1967_v2 = vld [vmem:[%s4626_s9 + $0x230] sm:$0xff] }
  0x83   :  { %1317 = vmatmul.mubr.bf16.gmra.mrb[48].mxu0 %v3196_v6  ;;  %v1936_v6 = vld [vmem:[%s4626_s9 + $0x138] sm:$0xff] }
  0x84   :  { %1478 = vmatmul.mubr.bf16.gmra.mrb[48].mxu1 %v3197_v8  ;;  %1324 = vmatprep.mubr.bf16.mxu0 %v3200_v9  ;;  %v3240_v8 = vld [vmem:[%s4621_s5 + $0xd0] ss:$24 sps:$4 sm:$0xff]   ;;  %v2969_v9 = vpack.c.bf16 %v1936_v6, %v1932_v5  ;;  %v1929_v6 = vld [vmem:[%s4626_s9 + $0x100] sm:$0xff] }
  0x85   :  { %1485 = vmatprep.mubr.bf16.mxu1 %v3202_v10  ;;  %v1935_v10 = vld [vmem:[%s4626_s9 + $0x130] sm:$0xff]  ;;  %v1934_v5 = vld [vmem:[%s4626_s9 + $0x128] sm:$0xff] }
  0x86   :  { %v2971_v12 = vpack.c.bf16 %v1935_v10, %v1931_v7  ;;  %v1933_v7 = vld [vmem:[%s4626_s9 + $0x120] sm:$0xff]  ;;  %v3252_v10 = vld [vmem:[%s4621_s5 + $0x190] ss:$24 sps:$4 sm:$0xff]  }
  0x8b   :  { %1325 = vmatmul.mubr.bf16.gmra.mrb[52].mxu0 %v3204_v13  ;;  %v1940_v13 = vld [vmem:[%s4626_s9 + $0x158] sm:$0xff] }
  0x8c   :  { %1486 = vmatmul.mubr.bf16.gmra.mrb[52].mxu1 %v3205_v14  ;;  %1332 = vmatprep.mubr.bf16.mxu0 %v3206_v15  ;;  %v1944_v14 = vld [vmem:[%s4626_s9 + $0x178] sm:$0xff] }
  0x8d   :  { %1493 = vmatprep.mubr.bf16.mxu1 %v3208_v16  ;;  %v2973_v15 = vpack.c.bf16 %v1944_v14, %v1940_v13  ;;  %v1939_v16 = vld [vmem:[%s4626_s9 + $0x150] sm:$0xff]  ;;  %v3253_v13 = vld [vmem:[%s4621_s5 + $0x1c4] ss:$24 sps:$4 sm:$0xff]  }
  0x93   :  { %1333 = vmatmul.mubr.bf16.gmra.mrb[56].mxu0 %v3210_v19  ;;  %v2975_v19 = vpack.c.bf16 %v1943_v17, %v1939_v16  ;;  %v1941_v16 = vld [vmem:[%s4626_s9 + $0x160] sm:$0xff]  ;;  %v1972_v17 = vld [vmem:[%s4626_s9 + $0x258] sm:$0xff] }
  0x94   :  { %1494 = vmatmul.mubr.bf16.gmra.mrb[56].mxu1 %v3211_v20  ;;  %1340 = vmatprep.mubr.bf16.mxu0 %v3214_v21  ;;  %v3244_v20 = vld [vmem:[%s4621_s5 + $0x134] ss:$24 sps:$4 sm:$0xff]  }
  0x95   :  { %1501 = vmatprep.mubr.bf16.mxu1 %v3216_v22  ;;  %v1898_v21 = vld [vmem:[%s4626_s9 + $0x8] sm:$0xff] }
  0x96   :  { %v1902_v22 = vld [vmem:[%s4626_s9 + $0x28] sm:$0xff] }
  0x9b   :  { %1341 = vmatmul.mubr.bf16.gmra.mrb[60].mxu0 %v3218_v25  ;;  %v1947_v25 = vld [vmem:[%s4626_s9 + $0x190] sm:$0xff] }
  0x9c   :  { %1502 = vmatmul.mubr.bf16.gmra.mrb[60].mxu1 %v3219_v26  ;;  %1542 = vmatprep.mubr.bf16.mxu0 %v3222_v27  ;;  %v2889_v26 = vpack.c.bf16 %v1902_v22, %v1898_v21  ;;  %v2977_v27 = vpack.c.bf16 %v1952_v24, %v1948_v23  ;;  %v1975_v22 = vld [vmem:[%s4626_s9 + $0x270] sm:$0xff]  ;;  %v1946_v24 = vld [vmem:[%s4626_s9 + $0x188] sm:$0xff] }
  0x9d   :  { %1654 = vmatprep.mubr.bf16.mxu1 %v3225_v28  ;;  %v1951_v28 = vld [vmem:[%s4626_s9 + $0x1b0] sm:$0xff] }
  0xa3   :  { %1543 = vmatmul.mubr.bf16.vlgmr.msra.gmra.mrb[64].mxu0 %v3220_v31  ;;  %v2979_v31 = vpack.c.bf16 %v1951_v28, %v1947_v25  ;;  %v1950_v25 = vld [vmem:[%s4626_s9 + $0x1a8] sm:$0xff]  ;;  %v1949_v28 = vld [vmem:[%s4626_s9 + $0x1a0] sm:$0xff] }
  0xa4   :  { %1655 = vmatmul.mubr.bf16.vlgmr.msra.gmra.mrb[64].mxu1 %v3223_v32  ;;  %1550 = vmatprep.mubr.bf16.mxu0 %v3226_v33  ;;  %v2891_v32 = vpack.c.bf16 %v1901_v30, %v1897_v29  ;;  %v3246_v33 = vld [vmem:[%s4621_s5 + $0x130] ss:$24 sps:$4 sm:$0xff]   ;;  %v3255_v30 = vld [vmem:[%s4621_s5 + $0x1c0] ss:$24 sps:$4 sm:$0xff]  }
  0xa5   :  { %2888 = vmatpush1.bf16.msk.msra.mxu1 %vm3649_vm2, %v2886_v34  ;;  %1662 = vmatprep.mubr.bf16.mxu1 %v3228_v35  ;;  %v1906_v34 = vld [vmem:[%s4626_s9 + $0x48] sm:$0xff] }
  0xa6   :  { %2956 = vmatpush1.bf16.msra.mxu0 %v2955_v41  ;;  %2890 = vmatprep.subr.bf16.mxu1 %v2889_v26  ;;  %v1910_v35 = vld [vmem:[%s4626_s9 + $0x68] sm:$0xff]  ;;  %v1956_v41 = vld [vmem:[%s4626_s9 + $0x1d8] sm:$0xff]  ;;  %v2913_v26 = vpack.c.bf16 %v1950_v25, %v1946_v24 }
  0xa7   :  { %2958 = vmatprep.subr.bf16.mxu0 %v2957_v48  ;;  %v2893_v37 = vpack.c.bf16 %v1910_v35, %v1906_v34  ;;  %v2983_v48 = vpack.c.bf16 %v1959_v46, %v1955_v44  ;;  %v1954_v34 = vld [vmem:[%s4626_s9 + $0x1c8] sm:$0xff] }
  0xa8   :  { %v1962_v44 = vld [vmem:[%s4626_s9 + $0x208] sm:$0xff] }
  0xa9   :  { %v1966_v46 = vld [vmem:[%s4626_s9 + $0x228] sm:$0xff] }
  0xaa   :  { %2960 = vmatpush1.bf16.msra.mxu0 %v2959_v50  ;;  %v1913_v50 = vld [vmem:[%s4626_s9 + $0x80] sm:$0xff] }
  0xab   :  { %1551 = vmatmul.mubr.bf16.gmra.mrb[68].mxu0 %v3230_v42  ;;  %2962 = vmatprep.subr.bf16.mxu0 %v2961_v56  ;;  %v1960_v42 = vld [vmem:[%s4626_s9 + $0x1f8] sm:$0xff]  ;;  %v1926_v56 = vld [vmem:[%s4626_s9 + $0xe8] sm:$0xff] }
  0xac   :  { %1663 = vmatmul.mubr.bf16.gmra.mrb[68].mxu1 %v3231_v43  ;;  %1558 = vmatprep.mubr.bf16.mxu0 %v3232_v45  ;;  %v1914_v43 = vld [vmem:[%s4626_s9 + $0x88] sm:$0xff]  ;;  %v2981_v45 = vpack.c.bf16 %v1960_v42, %v1956_v41 }
  0xad   :  { %1888 = vmatprep.mubr.f32.mxu1 %v4631_v51  ;;  %v2897_v49 = vpack.c.bf16 %v1918_v47, %v1914_v43  ;;  %v4108_v43 = vpop.xlane.xlu0 %1790  ;;  %v2921_v47 = vpack.c.bf16 %v1966_v46, %v1962_v44  ;;  %v1993_v44 = vld [vmem:[%s4626_s9 + $0x300] sm:$0xff] }
  0xae   :  { %2964 = vmatpush1.bf16.msra.mxu0 %v2963_v60  ;;  %v1925_v60 = vld [vmem:[%s4626_s9 + $0xe0] sm:$0xff] }
  0xaf   :  { %2966 = vmatprep.subr.bf16.mxu0 %v2965_v0  ;;  %v2985_v0 = vpack.c.bf16 %v1968_v62, %v1964_v61  ;;  %v1997_v46 = vld [vmem:[%s4626_s9 + $0x320] sm:$0xff] }
  0xb1   :  { %v263_v61 = vpop.permute.xlu0 %262 }
  0xb2   :  { %2968 = vmatpush1.bf16.msra.mxu0 %v2967_v4  ;;  %v2987_v4 = vpack.c.bf16 %v1967_v2, %v1963_v1  ;;  %v1973_v1 = vld [vmem:[%s4626_s9 + $0x260] sm:$0xff] }
  0xb3   :  { %1559 = vmatmul.mubr.bf16.gmra.mrb[72].mxu0 %v3234_v52  ;;  %2970 = vmatprep.subr.bf16.mxu0 %v2969_v9  ;;  %v1917_v52 = vld [vmem:[%s4626_s9 + $0xa0] sm:$0xff]  ;;  %v2907_v9 = vpack.c.bf16 %v1933_v7, %v1929_v6 }
  0xb4   :  { %2506 = vmatmul.mubr.msk.f32.vlgmr.msra.gmra.mrb[72].mxu1 %vm1813_vm3, %v1796_v57  ;;  %1566 = vmatprep.mubr.bf16.mxu0 %v3235_v55  ;;  %v2899_v53 = vpack.c.bf16 %v1917_v52, %v1913_v50  ;;  %v1922_v55 = vld [vmem:[%s4626_s9 + $0xc8] sm:$0xff]  ;;  %v1977_v7 = vld [vmem:[%s4626_s9 + $0x280] sm:$0xff] }
  0xb5   :  { %2892 = vmatpush1.bf16.msra.mxu1 %v2891_v32  ;;  %v3250_v57 = vld [vmem:[%s4621_s5 + $0x194] ss:$24 sps:$4 sm:$0xff]   ;;  %v2901_v58 = vpack.c.bf16 %v1926_v56, %v1922_v55  ;;  %v1980_v32 = vld [vmem:[%s4626_s9 + $0x298] sm:$0xff]  ;;  %v3258_v50 = vld [vmem:[%s4621_s5 + $0x1f0] ss:$24 sps:$4 sm:$0xff]   ;;  %v4134_v56 = vpop.xlane.xlu1 %1779 }
  0xb6   :  { %2972 = vmatpush1.bf16.msra.mxu0 %v2971_v12  ;;  %2894 = vmatprep.subr.bf16.mxu1 %v2893_v37  ;;  %v1942_v12 = vld [vmem:[%s4626_s9 + $0x168] sm:$0xff]  ;;  %v1953_v37 = vld [vmem:[%s4626_s9 + $0x1c0] sm:$0xff]  ;;  %v1992_v55 = vld [vmem:[%s4626_s9 + $0x2f8] sm:$0xff] }
  0xb7   :  { %2974 = vmatprep.subr.bf16.mxu0 %v2973_v15  ;;  %v1937_v15 = vld [vmem:[%s4626_s9 + $0x140] sm:$0xff]  ;;  %v2919_v42 = vpack.c.bf16 %v1957_v38, %v1953_v37 }
  0xb9   :  { %2896 = vmatpush1.bf16.msra.mxu1 %v2895_v40  ;;  %v1983_v40 = vld [vmem:[%s4626_s9 + $0x2b0] sm:$0xff] }
  0xba   :  { %2976 = vmatpush1.bf16.msra.mxu0 %v2975_v19  ;;  %2898 = vmatprep.subr.bf16.mxu1 %v2897_v49  ;;  %v1971_v19 = vld [vmem:[%s4626_s9 + $0x250] sm:$0xff]  ;;  %v1965_v49 = vld [vmem:[%s4626_s9 + $0x220] sm:$0xff] }
  0xbb   :  { %1567 = vmatmul.mubr.bf16.gmra.mrb[76].mxu0 %v3237_v63  ;;  %2978 = vmatprep.subr.bf16.mxu0 %v2977_v27  ;;  %v2903_v63 = vpack.c.bf16 %v1925_v60, %v1921_v59  ;;  %v2991_v23 = vpack.c.bf16 %v1975_v22, %v1971_v19  ;;  %v1945_v27 = vld [vmem:[%s4626_s9 + $0x180] sm:$0xff]  ;;  %v1991_v59 = vld [vmem:[%s4626_s9 + $0x2f0] sm:$0xff]  ;;  %v1970_v60 = vld [vmem:[%s4626_s9 + $0x248] sm:$0xff] }
  0xbc   :  { %1574 = vmatprep.mubr.bf16.mxu0 %v3238_v3  ;;  %v1930_v3 = vld [vmem:[%s4626_s9 + $0x108] sm:$0xff]  ;;  %v2915_v29 = vpack.c.bf16 %v1949_v28, %v1945_v27 }
  0xbd   :  { %2900 = vmatpush1.bf16.msra.mxu1 %v2899_v53  ;;  %v3259_v53 = vld [vmem:[%s4621_s5 + $0x224] ss:$24 sps:$4 sm:$0xff]   ;;  %v1990_v22 = vld [vmem:[%s4626_s9 + $0x2e8] sm:$0xff] }
  0xbe   :  { %2980 = vmatpush1.bf16.msra.mxu0 %v2979_v31  ;;  %2902 = vmatprep.subr.bf16.mxu1 %v2901_v58  ;;  %v3256_v31 = vld [vmem:[%s4621_s5 + $0x1f4] ss:$24 sps:$4 sm:$0xff]  }
  0xbf   :  { %2982 = vmatprep.subr.bf16.mxu0 %v2981_v45  ;;  %v2995_v45 = vpack.c.bf16 %v1983_v40, %v1979_v39  ;;  %v1987_v58 = vld [vmem:[%s4626_s9 + $0x2d0] sm:$0xff]  ;;  %v1994_v39 = vld [vmem:[%s4626_s9 + $0x308] sm:$0xff] }
  0xc0   :  { %v2999_v62 = vpack.c.bf16 %v1991_v59, %v1987_v58  ;;  %v1998_v40 = vld [vmem:[%s4626_s9 + $0x328] sm:$0xff]  ;;  %v2008_v58 = vld [vmem:[%s4626_s9 + $0x378] sm:$0xff] }
  0xc1   :  { %2904 = vmatpush1.bf16.msra.mxu1 %v2903_v63  ;;  %v1974_v63 = vld [vmem:[%s4626_s9 + $0x268] sm:$0xff] }
  0xc2   :  { %2984 = vmatpush1.bf16.msra.mxu0 %v2983_v48  ;;  %v1961_v48 = vld [vmem:[%s4626_s9 + $0x200] sm:$0xff]  ;;  %v2925_v2 = vpack.c.bf16 %v1974_v63, %v1970_v60  ;;  %v2002_v59 = vld [vmem:[%s4626_s9 + $0x348] sm:$0xff] }
  0xc3   :  { %1575 = vmatmul.mubr.bf16.gmra.mrb[80].mxu0 %v3240_v8  ;;  %2986 = vmatprep.subr.bf16.mxu0 %v2985_v0  ;;  %v2905_v8 = vpack.c.bf16 %v1934_v5, %v1930_v3  ;;  %v2923_v52 = vpack.c.bf16 %v1965_v49, %v1961_v48  ;;  %v1969_v0 = vld [vmem:[%s4626_s9 + $0x240] sm:$0xff]  ;;  %v1982_v5 = vld [vmem:[%s4626_s9 + $0x2a8] sm:$0xff] }
  0xc4   :  { %1582 = vmatprep.mubr.bf16.mxu0 %v3241_v11  ;;  %v1938_v11 = vld [vmem:[%s4626_s9 + $0x148] sm:$0xff]  ;;  %v2927_v3 = vpack.c.bf16 %v1973_v1, %v1969_v0  ;;  %v2003_v0 = vld [vmem:[%s4626_s9 + $0x350] sm:$0xff] }
  0xc5   :  { %2906 = vmatprep.subr.bf16.mxu1 %v2905_v8  ;;  %v2909_v14 = vpack.c.bf16 %v1942_v12, %v1938_v11  ;;  %v1981_v8 = vld [vmem:[%s4626_s9 + $0x2a0] sm:$0xff]  ;;  %v2007_v1 = vld [vmem:[%s4626_s9 + $0x370] sm:$0xff] }
  0xc6   :  { %2988 = vmatpush1.bf16.msra.mxu0 %v2987_v4  ;;  %2908 = vmatpush1.bf16.msra.mxu1 %v2907_v9  ;;  %v1978_v4 = vld [vmem:[%s4626_s9 + $0x288] sm:$0xff]  ;;  %v3261_v9 = vld [vmem:[%s4621_s5 + $0x220] ss:$24 sps:$4 sm:$0xff]   ;;  %v2931_v11 = vpack.c.bf16 %v1981_v8, %v1977_v7 }
  0xc7   :  { %2910 = vmatprep.subr.bf16.mxu1 %v2909_v14  ;;  %v2929_v6 = vpack.c.bf16 %v1982_v5, %v1978_v4  ;;  %v1996_v14 = vld [vmem:[%s4626_s9 + $0x318] sm:$0xff]  ;;  %v2001_v8 = vld [vmem:[%s4626_s9 + $0x340] sm:$0xff] }
  0xcb   :  { %1583 = vmatmul.mubr.bf16.gmra.mrb[84].mxu0 %v3243_v18  ;;  %v1976_v18 = vld [vmem:[%s4626_s9 + $0x278] sm:$0xff] }
  0xcc   :  { %1590 = vmatprep.mubr.bf16.mxu0 %v3244_v20  ;;  %v2911_v20 = vpack.c.bf16 %v1941_v16, %v1937_v15  ;;  %v2989_v21 = vpack.c.bf16 %v1976_v18, %v1972_v17  ;;  %v2000_v15 = vld [vmem:[%s4626_s9 + $0x338] sm:$0xff]  ;;  %v1995_v16 = vld [vmem:[%s4626_s9 + $0x310] sm:$0xff] }
  0xcd   :  { %v3001_v19 = vpack.c.bf16 %v2000_v15, %v1996_v14 }
  0xce   :  { %2990 = vmatprep.subr.bf16.mxu0 %v2989_v21  ;;  %2912 = vmatpush1.bf16.msra.mxu1 %v2911_v20  ;;  %v1999_v20 = vld [vmem:[%s4626_s9 + $0x330] sm:$0xff]  ;;  %v1986_v21 = vld [vmem:[%s4626_s9 + $0x2c8] sm:$0xff] }
  0xcf   :  { %2992 = vmatpush1.bf16.msra.mxu0 %v2991_v23  ;;  %2914 = vmatprep.subr.bf16.mxu1 %v2913_v26  ;;  %v3262_v26 = vld [vmem:[%s4621_s5 + $0x254] ss:$24 sps:$4 sm:$0xff]   ;;  %v3003_v27 = vpack.c.bf16 %v1999_v20, %v1995_v16  ;;  %v2933_v28 = vpack.c.bf16 %v1990_v22, %v1986_v21 }
  0xd0   :  { %v2011_v22 = vld [vmem:[%s4626_s9 + $0x390] sm:$0xff] }
  0xd2   :  { %2916 = vmatpush1.bf16.msra.mxu1 %v2915_v29  ;;  %v1985_v29 = vld [vmem:[%s4626_s9 + $0x2c0] sm:$0xff] }
  0xd3   :  { %1591 = vmatmul.mubr.bf16.gmra.mrb[88].mxu0 %v3246_v33  ;;  %v1984_v33 = vld [vmem:[%s4626_s9 + $0x2b8] sm:$0xff] }
  0xd4   :  { %1598 = vmatprep.mubr.bf16.mxu0 %v3247_v36  ;;  %v2993_v35 = vpack.c.bf16 %v1984_v33, %v1980_v32  ;;  %v1958_v36 = vld [vmem:[%s4626_s9 + $0x1e8] sm:$0xff] }
  0xd5   :  { %v2917_v41 = vpack.c.bf16 %v1958_v36, %v1954_v34 }
  0xd6   :  { %2994 = vmatprep.subr.bf16.mxu0 %v2993_v35 }
  0xd7   :  { %2918 = vmatprep.subr.bf16.mxu1 %v2917_v41  ;;  %2996 = vmatpush1.bf16.msra.mxu0 %v2995_v45  ;;  %v2937_v45 = vpack.c.bf16 %v1998_v40, %v1994_v39  ;;  %v2020_v39 = vld [vmem:[%s4626_s9 + $0x3d8] sm:$0xff] }
  0xd8   :  { %2920 = vmatpush1.bf16.msra.mxu1 %v2919_v42 }
  0xd9   :  { %2922 = vmatprep.subr.bf16.mxu1 %v2921_v47  ;;  %v2939_v47 = vpack.c.bf16 %v1997_v46, %v1993_v44  ;;  %v2024_v46 = vld [vmem:[%s4626_s9 + $0x3f8] sm:$0xff] }
  0xdb   :  { %1599 = vmatmul.mubr.bf16.gmra.mrb[92].mxu0 %v3249_v54  ;;  %v1988_v54 = vld [vmem:[%s4626_s9 + $0x2d8] sm:$0xff] }
  0xdc   :  { %1606 = vmatprep.mubr.bf16.mxu0 %v3250_v57  ;;  %v2997_v57 = vpack.c.bf16 %v1992_v55, %v1988_v54  ;;  %2924 = vmatpush1.bf16.msra.mxu1 %v2923_v52 }
  0xdd   :  { %2926 = vmatprep.subr.bf16.mxu1 %v2925_v2  ;;  %v2006_v2 = vld [vmem:[%s4626_s9 + $0x368] sm:$0xff] }
  0xde   :  { %2998 = vmatprep.subr.bf16.mxu0 %v2997_v57  ;;  %v2004_v57 = vld [vmem:[%s4626_s9 + $0x358] sm:$0xff]  ;;  %v2941_v7 = vpack.c.bf16 %v2006_v2, %v2002_v59 }
  0xdf   :  { %3000 = vmatpush1.bf16.msra.mxu0 %v2999_v62  ;;  %v3005_v63 = vpack.c.bf16 %v2008_v58, %v2004_v57  ;;  %v2019_v57 = vld [vmem:[%s4626_s9 + $0x3d0] sm:$0xff] }
  0xe0   :  { %2928 = vmatpush1.bf16.msra.mxu1 %v2927_v3  ;;  %3002 = vmatprep.subr.bf16.mxu0 %v3001_v19  ;;  %v2023_v58 = vld [vmem:[%s4626_s9 + $0x3f0] sm:$0xff] }
  0xe1   :  { %2930 = vmatprep.subr.bf16.mxu1 %v2929_v6  ;;  %v3007_v6 = vpack.c.bf16 %v2007_v1, %v2003_v0 }
  0xe3   :  { %1607 = vmatmul.mubr.bf16.gmra.mrb[96].mxu0 %v3252_v10  ;;  %v4169_v10 = vpop.permute.xlu1 %272 }
  0xe4   :  { %1614 = vmatprep.mubr.bf16.mxu0 %v3253_v13  ;;  %v268_v13 = vpop.permute.xlu0 %267  ;;  %2932 = vmatpush1.bf16.msra.mxu1 %v2931_v11 }
  0xe5   :  { %3004 = vmatpush1.bf16.msra.mxu0 %v3003_v27  ;;  %2934 = vmatprep.subr.bf16.mxu1 %v2933_v28  ;;  %v2009_v28 = vld [vmem:[%s4626_s9 + $0x380] sm:$0xff] }
  0xe6   :  { %3006 = vmatprep.subr.bf16.mxu0 %v3005_v63 }
  0xe7   :  { %v278_v52 = vpop.permute.xlu1 %277 }
  0xe8   :  { %v283_v14 = vpop.permute.xlu0 %282 }
  0xe9   :  { %3008 = vmatpush1.bf16.msra.mxu0 %v3007_v6 }
  0xeb   :  { %1615 = vmatmul.mubr.bf16.gmra.mrb[100].mxu0 %v3255_v30  ;;  %v1989_v30 = vld [vmem:[%s4626_s9 + $0x2e0] sm:$0xff] }
  0xec   :  { %1622 = vmatprep.mubr.bf16.mxu0 %v3256_v31  ;;  %v2935_v34 = vpack.c.bf16 %v1989_v30, %v1985_v29  ;;  %v2013_v29 = vld [vmem:[%s4626_s9 + $0x3a0] sm:$0xff] }
  0xee   :  { %2936 = vmatpush1.bf16.msra.mxu1 %v2935_v34  ;;  %v2947_v34 = vpack.c.bf16 %v2013_v29, %v2009_v28 }
  0xef   :  { %2938 = vmatprep.subr.bf16.mxu1 %v2937_v45 }
  0xf2   :  { %2940 = vmatpush1.bf16.msra.mxu1 %v2939_v47  ;;  %v2017_v47 = vld [vmem:[%s4626_s9 + $0x3c0] sm:$0xff] }
  0xf3   :  { %1623 = vmatmul.mubr.bf16.gmra.mrb[104].mxu0 %v3258_v50  ;;  %v3264_v50 = vld [vmem:[%s4621_s5 + $0x250] ss:$24 sps:$4 sm:$0xff]   ;;  %2942 = vmatprep.subr.bf16.mxu1 %v2941_v7 }
  0xf4   :  { %1630 = vmatprep.mubr.bf16.mxu0 %v3259_v53  ;;  %v3265_v53 = vld [vmem:[%s4621_s5 + $0x284] ss:$24 sps:$4 sm:$0xff]  }
  0xf6   :  { %v2528_v12 = vpop.f32.mrb[0].mxu0 }
  0xf7   :  { %v2640_v17 = vpop.f32.mrb[0].mxu1  ;;  %v2529_v18 = vpop.f32.mrb[1].mxu0 }
  0xf8   :  { %v2530_v23 = vadd.f32 %v2529_v18, %v2528_v12  ;;  %v2641_v24 = vpop.f32.mrb[1].mxu1  ;;  %v2531_v25 = vpop.f32.mrb[2].mxu0  ;;  %v2016_v18 = vld [vmem:[%s4626_s9 + $0x3b8] sm:$0xff] }
  0xf9   :  { %v2642_v31 = vadd.f32 %v2641_v24, %v2640_v17  ;;  %v2643_v32 = vpop.f32.mrb[2].mxu1  ;;  %v2532_v33 = vpop.f32.mrb[3].mxu0  ;;  %v2012_v17 = vld [vmem:[%s4626_s9 + $0x398] sm:$0xff]  ;;  %v2014_v24 = vld [vmem:[%s4626_s9 + $0x3a8] sm:$0xff] }
  0xfa   :  { %v1223_v35 = vadd.f32 %v2530_v23, %v263_v61  ;;  %v2533_v36 = vadd.f32 %v2532_v33, %v2531_v25  ;;  %v2644_v37 = vpop.f32.mrb[3].mxu1  ;;  %v3009_v21 = vpack.c.bf16 %v2016_v18, %v2012_v17  ;;  %v2015_v23 = vld [vmem:[%s4626_s9 + $0x3b0] sm:$0xff]  ;;  %v288_v25 = vpop.permute.xlu1 %287 }
  0xfb   :  { %v2645_v38 = vadd.f32 %v2644_v37, %v2643_v32  ;;  %1631 = vmatmul.mubr.bf16.gmra.mrb[108].mxu0 %v3261_v9  ;;  %v2005_v9 = vld [vmem:[%s4626_s9 + $0x360] sm:$0xff]  ;;  %v293_v33 = vpop.permute.xlu0 %292  ;;  %v2018_v37 = vld [vmem:[%s4626_s9 + $0x3c8] sm:$0xff] }
  0xfc   :  { %v4204_v41 = vadd.f32 %v2642_v31, %v1223_v35  ;;  %v1226_v42 = vadd.f32 %v2533_v36, %v268_v13  ;;  %1638 = vmatprep.mubr.bf16.mxu0 %v3262_v26  ;;  %v2943_v15 = vpack.c.bf16 %v2005_v9, %v2001_v8  ;;  %v3011_v26 = vpack.c.bf16 %v2015_v23, %v2011_v22  ;;  %v3267_v32 = vld [vmem:[%s4621_s5 + $0x280] ss:$24 sps:$4 sm:$0xff]  }
  0xfd   :  { %3010 = vmatprep.subr.bf16.mxu0 %v3009_v21 }
  0xfe   :  { %v4212_v48 = vadd.f32 %v2645_v38, %v1226_v42  ;;  %v2534_v49 = vpop.f32.mrb[4].mxu0  ;;  %2944 = vmatpush1.bf16.msra.mxu1 %v2943_v15  ;;  %v2022_v38 = vld [vmem:[%s4626_s9 + $0x3e8] sm:$0xff]  ;;  %3012 = vmatpush1.bf16.msra.mxu0 %v3011_v26 }
  0xff   :  { %v2646_v54 = vpop.f32.mrb[4].mxu1  ;;  %v2535_v55 = vpop.f32.mrb[5].mxu0  ;;  %v2949_v44 = vpack.c.bf16 %v2022_v38, %v2018_v37 }
 0x100   :  { %v2536_v60 = vadd.f32 %v2535_v55, %v2534_v49  ;;  %v2647_v61 = vpop.f32.mrb[5].mxu1  ;;  %v2537_v62 = vpop.f32.mrb[6].mxu0  ;;  %v2021_v49 = vld [vmem:[%s4626_s9 + $0x3e0] sm:$0xff] }
 0x101   :  { %v2648_v3 = vadd.f32 %v2647_v61, %v2646_v54  ;;  %v2649_v4 = vpop.f32.mrb[6].mxu1  ;;  %v2538_v5 = vpop.f32.mrb[7].mxu0  ;;  %v3013_v54 = vpack.c.bf16 %v2024_v46, %v2020_v39  ;;  %v2951_v55 = vpack.c.bf16 %v2021_v49, %v2017_v47 }
 0x102   :  { %v1231_v11 = vadd.f32 %v2536_v60, %v4169_v10  ;;  %v2539_v12 = vadd.f32 %v2538_v5, %v2537_v62  ;;  %v2650_v13 = vpop.f32.mrb[7].mxu1  ;;  %v2010_v10 = vld [vmem:[%s4626_s9 + $0x388] sm:$0xff]  ;;  %v3015_v62 = vpack.c.bf16 %v2023_v58, %v2019_v57 }
 0x103   :  { %v2651_v16 = vadd.f32 %v2650_v13, %v2649_v4  ;;  %1639 = vmatmul.mubr.bf16.gmra.mrb[112].mxu0 %v3264_v50  ;;  %v2945_v27 = vpack.c.bf16 %v2014_v24, %v2010_v10  ;;  %3014 = vmatprep.subr.bf16.mxu0 %v3013_v54  ;;  %v298_v4 = vpop.permute.xlu0 %297 }
 0x104   :  { %v4254_v19 = vadd.f32 %v2648_v3, %v1231_v11  ;;  %v1234_v20 = vadd.f32 %v2539_v12, %v278_v52  ;;  %1646 = vmatprep.mubr.bf16.mxu0 %v3265_v53  ;;  %3016 = vmatpush1.bf16.msra.mxu0 %v3015_v62 }
 0x105   :  { %2946 = vmatprep.subr.bf16.mxu1 %v2945_v27 }
 0x106   :  { %v4271_v30 = vadd.f32 %v2651_v16, %v1234_v20  ;;  %v2540_v31 = vpop.f32.mrb[8].mxu0  ;;  %2948 = vmatpush1.bf16.msra.mxu1 %v2947_v34  ;;  %v303_v20 = vpop.permute.xlu1 %302 }
 0x107   :  { %v2652_v35 = vpop.f32.mrb[8].mxu1  ;;  %v2541_v36 = vpop.f32.mrb[9].mxu0  ;;  %2950 = vmatprep.subr.bf16.mxu1 %v2949_v44 }
 0x108   :  { %v2542_v40 = vadd.f32 %v2541_v36, %v2540_v31  ;;  %v2653_v42 = vpop.f32.mrb[9].mxu1  ;;  %v2543_v45 = vpop.f32.mrb[10].mxu0 }
 0x109   :  { %v2654_v50 = vadd.f32 %v2653_v42, %v2652_v35  ;;  %v2655_v52 = vpop.f32.mrb[10].mxu1  ;;  %v2544_v53 = vpop.f32.mrb[11].mxu0 }
 0x10a   :  { %v2545_v59 = vadd.f32 %v2544_v53, %v2543_v45  ;;  %v2656_v60 = vpop.f32.mrb[11].mxu1  ;;  %v1239_v61 = vadd.f32 %v2542_v40, %v283_v14  ;;  %2952 = vmatpush1.bf16.msra.mxu1 %v2951_v55  ;;  %v308_v23 = vpop.permute.xlu0 %307 }
 0x10b   :  { %v2657_v63 = vadd.f32 %v2656_v60, %v2655_v52  ;;  %1647 = vmatmul.mubr.bf16.gmra.mrb[116].mxu0 %v3267_v32  ;;  %v313_v39 = vpop.permute.xlu1 %312 }
 0x10c   :  { %v4300_v0 = vadd.f32 %v2654_v50, %v1239_v61  ;;  %v1242_v1 = vadd.f32 %v2545_v59, %v288_v25 }
 0x10e   :  { %v4302_v2 = vadd.f32 %v2657_v63, %v1242_v1  ;;  %v2546_v3 = vpop.f32.mrb[12].mxu0  ;;  %v318_v45 = vpop.permute.xlu0 %317 }
 0x10f   :  { %v2658_v5 = vpop.f32.mrb[12].mxu1  ;;  %v2547_v6 = vpop.f32.mrb[13].mxu0 }
 0x110   :  { %v2548_v7 = vadd.f32 %v2547_v6, %v2546_v3  ;;  %v2659_v8 = vpop.f32.mrb[13].mxu1  ;;  %v2549_v9 = vpop.f32.mrb[14].mxu0 }
 0x111   :  { %v2660_v11 = vadd.f32 %v2659_v8, %v2658_v5  ;;  %v2661_v12 = vpop.f32.mrb[14].mxu1  ;;  %v2550_v13 = vpop.f32.mrb[15].mxu0 }
 0x112   :  { %v1247_v14 = vadd.f32 %v2548_v7, %v293_v33  ;;  %v2551_v15 = vadd.f32 %v2550_v13, %v2549_v9  ;;  %v2662_v16 = vpop.f32.mrb[15].mxu1  ;;  %v323_v62 = vpop.permute.xlu1 %322 }
 0x113   :  { %v2663_v17 = vadd.f32 %v2662_v16, %v2661_v12  ;;  %v328_v3 = vpop.permute.xlu0 %327 }
 0x114   :  { %v4304_v18 = vadd.f32 %v2660_v11, %v1247_v14  ;;  %v1250_v10 = vadd.f32 %v2551_v15, %v298_v4 }
 0x116   :  { %v4306_v21 = vadd.f32 %v2663_v17, %v1250_v10  ;;  %v2552_v22 = vpop.f32.mrb[16].mxu0 }
 0x117   :  { %v2664_v24 = vpop.f32.mrb[16].mxu1  ;;  %v2553_v25 = vpop.f32.mrb[17].mxu0 }
 0x118   :  { %v2554_v26 = vadd.f32 %v2553_v25, %v2552_v22  ;;  %v2665_v27 = vpop.f32.mrb[17].mxu1  ;;  %v2555_v28 = vpop.f32.mrb[18].mxu0 }
 0x119   :  { %v2666_v29 = vadd.f32 %v2665_v27, %v2664_v24  ;;  %v2667_v31 = vpop.f32.mrb[18].mxu1  ;;  %v2556_v32 = vpop.f32.mrb[19].mxu0 }
 0x11a   :  { %v2557_v33 = vadd.f32 %v2556_v32, %v2555_v28  ;;  %v2668_v34 = vpop.f32.mrb[19].mxu1  ;;  %v1255_v35 = vadd.f32 %v2554_v26, %v303_v20  ;;  %v333_v20 = vpop.permute.xlu1 %332 }
 0x11b   :  { %v2669_v36 = vadd.f32 %v2668_v34, %v2667_v31  ;;  %v338_v24 = vpop.permute.xlu0 %337 }
 0x11c   :  { %v4308_v37 = vadd.f32 %v2666_v29, %v1255_v35  ;;  %v1258_v38 = vadd.f32 %v2557_v33, %v308_v23 }
 0x11e   :  { %v4310_v40 = vadd.f32 %v2669_v36, %v1258_v38  ;;  %v2558_v42 = vpop.f32.mrb[20].mxu0 }
 0x11f   :  { %v2670_v44 = vpop.f32.mrb[20].mxu1  ;;  %v2559_v46 = vpop.f32.mrb[21].mxu0 }
 0x120   :  { %v2560_v47 = vadd.f32 %v2559_v46, %v2558_v42  ;;  %v2671_v49 = vpop.f32.mrb[21].mxu1  ;;  %v2561_v50 = vpop.f32.mrb[22].mxu0 }
 0x121   :  { %v2672_v52 = vadd.f32 %v2671_v49, %v2670_v44  ;;  %v2673_v53 = vpop.f32.mrb[22].mxu1  ;;  %v2562_v54 = vpop.f32.mrb[23].mxu0 }
 0x122   :  { %v2563_v55 = vadd.f32 %v2562_v54, %v2561_v50  ;;  %v2674_v57 = vpop.f32.mrb[23].mxu1  ;;  %v1263_v58 = vadd.f32 %v2560_v47, %v313_v39  ;;  %v348_v47 = vpop.permute.xlu0 %347 }
 0x123   :  { %v2675_v59 = vadd.f32 %v2674_v57, %v2673_v53 }
 0x124   :  { %v4312_v60 = vadd.f32 %v2672_v52, %v1263_v58  ;;  %v1266_v61 = vadd.f32 %v2563_v55, %v318_v45  ;;  %v343_v45 = vpop.permute.xlu1 %342 }
 0x126   :  { %v4314_v63 = vadd.f32 %v2675_v59, %v1266_v61  ;;  %v2564_v1 = vpop.f32.mrb[24].mxu0 }
 0x127   :  { %v2676_v4 = vpop.f32.mrb[24].mxu1  ;;  %v2565_v5 = vpop.f32.mrb[25].mxu0 }
 0x128   :  { %v2566_v6 = vadd.f32 %v2565_v5, %v2564_v1  ;;  %v2677_v7 = vpop.f32.mrb[25].mxu1  ;;  %v2567_v8 = vpop.f32.mrb[26].mxu0 }
 0x129   :  { %v2678_v9 = vadd.f32 %v2677_v7, %v2676_v4  ;;  %v2679_v11 = vpop.f32.mrb[26].mxu1  ;;  %v2568_v12 = vpop.f32.mrb[27].mxu0 }
 0x12a   :  { %v2569_v13 = vadd.f32 %v2568_v12, %v2567_v8  ;;  %v2680_v14 = vpop.f32.mrb[27].mxu1  ;;  %v1271_v15 = vadd.f32 %v2566_v6, %v323_v62  ;;  %v353_v5 = vpop.permute.xlu1 %352 }
 0x12b   :  { %v2681_v16 = vadd.f32 %v2680_v14, %v2679_v11  ;;  %v358_v8 = vpop.permute.xlu0 %357 }
 0x12c   :  { %v4316_v17 = vadd.f32 %v2678_v9, %v1271_v15  ;;  %v1274_v10 = vadd.f32 %v2569_v13, %v328_v3 }
 0x12e   :  { %v4318_v22 = vadd.f32 %v2681_v16, %v1274_v10  ;;  %v2570_v23 = vpop.f32.mrb[28].mxu0 }
 0x12f   :  { %v2682_v25 = vpop.f32.mrb[28].mxu1  ;;  %v2571_v26 = vpop.f32.mrb[29].mxu0 }
 0x130   :  { %v2572_v27 = vadd.f32 %v2571_v26, %v2570_v23  ;;  %v2683_v28 = vpop.f32.mrb[29].mxu1  ;;  %v2573_v29 = vpop.f32.mrb[30].mxu0 }
 0x131   :  { %v2684_v31 = vadd.f32 %v2683_v28, %v2682_v25  ;;  %v2685_v32 = vpop.f32.mrb[30].mxu1  ;;  %v2574_v33 = vpop.f32.mrb[31].mxu0 }
 0x132   :  { %v2575_v34 = vadd.f32 %v2574_v33, %v2573_v29  ;;  %v2686_v35 = vpop.f32.mrb[31].mxu1  ;;  %v1279_v36 = vadd.f32 %v2572_v27, %v333_v20  ;;  %v363_v28 = vpop.permute.xlu1 %362 }
 0x133   :  { %v2687_v38 = vadd.f32 %v2686_v35, %v2685_v32  ;;  %v368_v32 = vpop.permute.xlu0 %367 }
 0x134   :  { %v4320_v39 = vadd.f32 %v2684_v31, %v1279_v36  ;;  %v1282_v42 = vadd.f32 %v2575_v34, %v338_v24 }
 0x136   :  { %v4322_v44 = vadd.f32 %v2687_v38, %v1282_v42  ;;  %v2576_v46 = vpop.f32.mrb[32].mxu0 }
 0x137   :  { %v2688_v49 = vpop.f32.mrb[32].mxu1  ;;  %v2577_v50 = vpop.f32.mrb[33].mxu0 }
 0x138   :  { %v2578_v52 = vadd.f32 %v2577_v50, %v2576_v46  ;;  %v2689_v53 = vpop.f32.mrb[33].mxu1  ;;  %v2579_v54 = vpop.f32.mrb[34].mxu0 }
 0x139   :  { %v2690_v55 = vadd.f32 %v2689_v53, %v2688_v49  ;;  %v2691_v57 = vpop.f32.mrb[34].mxu1  ;;  %v2580_v58 = vpop.f32.mrb[35].mxu0 }
 0x13a   :  { %v2581_v59 = vadd.f32 %v2580_v58, %v2579_v54  ;;  %v2692_v61 = vpop.f32.mrb[35].mxu1  ;;  %v1287_v62 = vadd.f32 %v2578_v52, %v343_v45 }
 0x13b   :  { %v2693_v1 = vadd.f32 %v2692_v61, %v2691_v57 }
 0x13c   :  { %v4324_v3 = vadd.f32 %v2690_v55, %v1287_v62  ;;  %v1290_v4 = vadd.f32 %v2581_v59, %v348_v47  ;;  %v373_v55 = vpop.permute.xlu1 %372  ;;  %v378_v59 = vpop.permute.xlu0 %377 }
 0x13e   :  { %v4326_v6 = vadd.f32 %v2693_v1, %v1290_v4  ;;  %v2582_v7 = vpop.f32.mrb[36].mxu0 }
 0x13f   :  { %v2694_v9 = vpop.f32.mrb[36].mxu1  ;;  %v2583_v11 = vpop.f32.mrb[37].mxu0 }
 0x140   :  { %v2584_v12 = vadd.f32 %v2583_v11, %v2582_v7  ;;  %v2695_v13 = vpop.f32.mrb[37].mxu1  ;;  %v2585_v14 = vpop.f32.mrb[38].mxu0 }
 0x141   :  { %v2696_v15 = vadd.f32 %v2695_v13, %v2694_v9  ;;  %v2697_v16 = vpop.f32.mrb[38].mxu1  ;;  %v2586_v10 = vpop.f32.mrb[39].mxu0 }
 0x142   :  { %v2587_v20 = vadd.f32 %v2586_v10, %v2585_v14  ;;  %v2698_v23 = vpop.f32.mrb[39].mxu1  ;;  %v1295_v24 = vadd.f32 %v2584_v12, %v353_v5 }
 0x143   :  { %v2699_v25 = vadd.f32 %v2698_v23, %v2697_v16  ;;  %v388_v23 = vpop.permute.xlu0 %387 }
 0x144   :  { %v4328_v26 = vadd.f32 %v2696_v15, %v1295_v24  ;;  %v1298_v27 = vadd.f32 %v2587_v20, %v358_v8 }
 0x146   :  { %v4330_v29 = vadd.f32 %v2699_v25, %v1298_v27  ;;  %v2588_v31 = vpop.f32.mrb[40].mxu0 }
 0x147   :  { %v2700_v33 = vpop.f32.mrb[40].mxu1  ;;  %v2589_v34 = vpop.f32.mrb[41].mxu0 }
 0x148   :  { %v2590_v35 = vadd.f32 %v2589_v34, %v2588_v31  ;;  %v2701_v36 = vpop.f32.mrb[41].mxu1  ;;  %v2591_v38 = vpop.f32.mrb[42].mxu0 }
 0x149   :  { %v2702_v42 = vadd.f32 %v2701_v36, %v2700_v33  ;;  %v2703_v45 = vpop.f32.mrb[42].mxu1  ;;  %v2592_v46 = vpop.f32.mrb[43].mxu0 }
 0x14a   :  { %v2593_v47 = vadd.f32 %v2592_v46, %v2591_v38  ;;  %v2704_v49 = vpop.f32.mrb[43].mxu1  ;;  %v1303_v50 = vadd.f32 %v2590_v35, %v363_v28 }
 0x14b   :  { %v2705_v52 = vadd.f32 %v2704_v49, %v2703_v45 }
 0x14c   :  { %v4332_v53 = vadd.f32 %v2702_v42, %v1303_v50  ;;  %v1306_v54 = vadd.f32 %v2593_v47, %v368_v32  ;;  %v398_v47 = vpop.permute.xlu0 %397 }
 0x14e   :  { %v4334_v57 = vadd.f32 %v2705_v52, %v1306_v54  ;;  %v2594_v58 = vpop.f32.mrb[44].mxu0 }
 0x14f   :  { %v2706_v61 = vpop.f32.mrb[44].mxu1  ;;  %v2595_v62 = vpop.f32.mrb[45].mxu0 }
 0x150   :  { %v2596_v1 = vadd.f32 %v2595_v62, %v2594_v58  ;;  %v2707_v4 = vpop.f32.mrb[45].mxu1  ;;  %v2597_v5 = vpop.f32.mrb[46].mxu0 }
 0x151   :  { %v2708_v7 = vadd.f32 %v2707_v4, %v2706_v61  ;;  %v2709_v8 = vpop.f32.mrb[46].mxu1  ;;  %v2598_v9 = vpop.f32.mrb[47].mxu0 }
 0x152   :  { %v2599_v11 = vadd.f32 %v2598_v9, %v2597_v5  ;;  %v2710_v12 = vpop.f32.mrb[47].mxu1  ;;  %v1311_v13 = vadd.f32 %v2596_v1, %v373_v55  ;;  %v408_v9 = vpop.permute.xlu0 %407 }
 0x153   :  { %v2711_v14 = vadd.f32 %v2710_v12, %v2709_v8 }
 0x154   :  { %v4336_v15 = vadd.f32 %v2708_v7, %v1311_v13  ;;  %v1314_v16 = vadd.f32 %v2599_v11, %v378_v59 }
 0x156   :  { %v4338_v10 = vadd.f32 %v2711_v14, %v1314_v16  ;;  %v2600_v20 = vpop.f32.mrb[48].mxu0 }
 0x157   :  { %v2712_v24 = vpop.f32.mrb[48].mxu1  ;;  %v2601_v25 = vpop.f32.mrb[49].mxu0 }
 0x158   :  { %v4340_v27 = vadd.f32 %v2601_v25, %v2600_v20  ;;  %v2713_v28 = vpop.f32.mrb[49].mxu1  ;;  %v2603_v31 = vpop.f32.mrb[50].mxu0 }
 0x159   :  { %v4342_v32 = vadd.f32 %v2713_v28, %v2712_v24  ;;  %v2715_v33 = vpop.f32.mrb[50].mxu1  ;;  %v2604_v34 = vpop.f32.mrb[51].mxu0 }
 0x15a   :  { %v2605_v35 = vadd.f32 %v2604_v34, %v2603_v31  ;;  %v2716_v36 = vpop.f32.mrb[51].mxu1 }
 0x15b   :  { %v2717_v38 = vadd.f32 %v2716_v36, %v2715_v33  ;;  %v418_v36 = vpop.permute.xlu0 %417 }
 0x15c   :  { %v1322_v42 = vadd.f32 %v2605_v35, %v388_v23 }
 0x15e   :  { %v4344_v45 = vadd.f32 %v2717_v38, %v1322_v42  ;;  %v2606_v46 = vpop.f32.mrb[52].mxu0 }
 0x15f   :  { %v2718_v49 = vpop.f32.mrb[52].mxu1  ;;  %v2607_v50 = vpop.f32.mrb[53].mxu0 }
 0x160   :  { %v4346_v52 = vadd.f32 %v2607_v50, %v2606_v46  ;;  %v2719_v54 = vpop.f32.mrb[53].mxu1  ;;  %v2609_v55 = vpop.f32.mrb[54].mxu0 }
 0x161   :  { %v4348_v58 = vadd.f32 %v2719_v54, %v2718_v49  ;;  %v2721_v59 = vpop.f32.mrb[54].mxu1  ;;  %v2610_v61 = vpop.f32.mrb[55].mxu0 }
 0x162   :  { %v2611_v62 = vadd.f32 %v2610_v61, %v2609_v55  ;;  %v2722_v1 = vpop.f32.mrb[55].mxu1 }
 0x163   :  { %v2723_v4 = vadd.f32 %v2722_v1, %v2721_v59 }
 0x164   :  { %v1330_v5 = vadd.f32 %v2611_v62, %v398_v47 }
 0x166   :  { %v4350_v7 = vadd.f32 %v2723_v4, %v1330_v5  ;;  %v2612_v8 = vpop.f32.mrb[56].mxu0 }
 0x167   :  { %v2724_v11 = vpop.f32.mrb[56].mxu1  ;;  %v2613_v12 = vpop.f32.mrb[57].mxu0 }
 0x168   :  { %v4352_v13 = vadd.f32 %v2613_v12, %v2612_v8  ;;  %v2725_v14 = vpop.f32.mrb[57].mxu1  ;;  %v2615_v16 = vpop.f32.mrb[58].mxu0 }
 0x169   :  { %v4354_v20 = vadd.f32 %v2725_v14, %v2724_v11  ;;  %v2727_v23 = vpop.f32.mrb[58].mxu1  ;;  %v2616_v24 = vpop.f32.mrb[59].mxu0 }
 0x16a   :  { %v2617_v25 = vadd.f32 %v2616_v24, %v2615_v16  ;;  %v2728_v28 = vpop.f32.mrb[59].mxu1  ;;  %v4633_v16 = vlaneseq }
 0x16b   :  { %v2729_v31 = vadd.f32 %v2728_v28, %v2727_v23 }
 0x16c   :  { %v1338_v33 = vadd.f32 %v2617_v25, %v408_v9 }
 0x16e   :  { %v1499_v34 = vadd.f32 %v2729_v31, %v1338_v33  ;;  %v2618_v35 = vpop.f32.mrb[60].mxu0 }
 0x16f   :  { %v2730_v38 = vpop.f32.mrb[60].mxu1  ;;  %v2619_v42 = vpop.f32.mrb[61].mxu0 }
 0x170   :  { %v4356_v46 = vadd.f32 %v2619_v42, %v2618_v35  ;;  %v2731_v47 = vpop.f32.mrb[61].mxu1  ;;  %v2621_v49 = vpop.f32.mrb[62].mxu0 }
 0x171   :  { %v4358_v50 = vadd.f32 %v2731_v47, %v2730_v38  ;;  %v2733_v54 = vpop.f32.mrb[62].mxu1  ;;  %v2622_v55 = vpop.f32.mrb[63].mxu0  ;;  %v4369_v38 = vshrl.u32 %v4633_v16, 7 }
 0x172   :  { %v2623_v59 = vadd.f32 %v2622_v55, %v2621_v49  ;;  %v2734_v61 = vpop.f32.mrb[63].mxu1 }
 0x173   :  { %v2735_v62 = vadd.f32 %v2734_v61, %v2733_v54  ;;  %4637 = vst [vmem:[#allocation2_spill] sm:$0xff] %v4369_v38 }
 0x174   :  { %v1346_v1 = vadd.f32 %v2623_v59, %v418_v36 }
 0x176   :  { %v1507_v4 = vadd.f32 %v2735_v62, %v1346_v1  ;;  %v2752_v5 = vpop.f32.mrb[64].mxu0 }
 0x177   :  { %v2836_v8 = vpop.f32.mrb[64].mxu1  ;;  %v2753_v9 = vpop.f32.mrb[65].mxu0 }
 0x178   :  { %v2754_v11 = vadd.f32 %v2753_v9, %v2752_v5  ;;  %v2837_v12 = vpop.f32.mrb[65].mxu1  ;;  %v2755_v14 = vpop.f32.mrb[66].mxu0 }
 0x179   :  { %v4360_v23 = vadd.f32 %v2837_v12, %v2836_v8  ;;  %v2839_v24 = vpop.f32.mrb[66].mxu1  ;;  %v2756_v25 = vpop.f32.mrb[67].mxu0  ;;  %v1809_v8 = vsub.s32 1, %v4369_v38 }
 0x17a   :  { %v4363_v28 = vadd.f32 %v2754_v11, %v4204_v41  ;;  %v2757_v31 = vadd.f32 %v2756_v25, %v2755_v14  ;;  %v2840_v33 = vpop.f32.mrb[67].mxu1  ;;  %v1805_v41 = vsub.s32 0, %v4369_v38 }
 0x17b   :  { %v2841_v35 = vadd.f32 %v2840_v33, %v2839_v24 }
 0x17c   :  { %v4366_v36 = vadd.f32 %v2757_v31, %v4212_v48  ;;  %v1801_v48 = vld [vmem:[%s4628_s8] sm:$0x3] }
 0x17d   :  { %v4371_v42 = vadd.f32 %v2841_v35, %v1499_v34  ;;  %v1806_v24 = vrot.slane %v1801_v48, %v1805_v41  ;;  %v1810_v31 = vrot.slane %v1801_v48, %v1809_v8  ;;  %v1671_v8 = vmul.f32 %v4363_v28, %v4363_v28 }
 0x17e   :  { %v2758_v47 = vpop.f32.mrb[68].mxu0 }
 0x17f   :  { %v2842_v49 = vpop.f32.mrb[68].mxu1  ;;  %v2759_v54 = vpop.f32.mrb[69].mxu0 }
 0x180   :  { %v2760_v55 = vadd.f32 %v2759_v54, %v2758_v47  ;;  %v2843_v59 = vpop.f32.mrb[69].mxu1  ;;  %v2761_v61 = vpop.f32.mrb[70].mxu0 }
 0x181   :  { %v4374_v62 = vadd.f32 %v2843_v59, %v2842_v49  ;;  %v2845_v1 = vpop.f32.mrb[70].mxu1  ;;  %v2762_v5 = vpop.f32.mrb[71].mxu0 }
 0x182   :  { %v4381_v34 = vadd.f32 %v2760_v55, %v4254_v19  ;;  %v2763_v9 = vadd.f32 %v2762_v5, %v2761_v61  ;;  %v2846_v11 = vpop.f32.mrb[71].mxu1 }
 0x183   :  { %v2847_v12 = vadd.f32 %v2846_v11, %v2845_v1 }
 0x184   :  { %v4384_v14 = vadd.f32 %v2763_v9, %v4271_v30 }
 0x185   :  { %v4386_v25 = vadd.f32 %v2847_v12, %v1507_v4  ;;  %v1672_v4 = vmul.f32 %v4366_v36, %v4366_v36 }
 0x186   :  { %v2764_v33 = vpop.f32.mrb[72].mxu0 }
 0x187   :  { %v1890_v35 = vpop.f32.mrb[72].mxu1  ;;  %v2765_v47 = vpop.f32.mrb[73].mxu0 }
 0x188   :  { %v1891_v49 = vadd.f32 %v1890_v35, %v1806_v24  ;;  %v2766_v54 = vadd.f32 %v2765_v47, %v2764_v33  ;;  %v1892_v59 = vpop.f32.mrb[73].mxu1  ;;  %v2767_v51 = vpop.f32.mrb[74].mxu0 }
 0x189   :  { %v1893_v16 = vadd.f32 %v1892_v59, %v1810_v31  ;;  %v2768_v19 = vpop.f32.mrb[75].mxu0  ;;  %v1674_v31 = vmul.f32 %v4384_v14, %v4384_v14 }
 0x18a   :  { %v4389_v55 = vadd.f32 %v2766_v54, %v4300_v0  ;;  %v2769_v61 = vadd.f32 %v2768_v19, %v2767_v51  ;;  %v1895_v30 = vmax.f32 %v1891_v49, 0.0  ;;  %v1673_v51 = vmul.f32 %v4381_v34, %v4381_v34 }
 0x18b   :  { %v1896_v1 = vmax.f32 %v1893_v16, 0.0 }
 0x18c   :  { %v4392_v41 = vadd.f32 %v2769_v61, %v4302_v2  ;;  %v1703_v2 = vadd.f32 %v1672_v4, %v1671_v8  ;;  %v1675_v35 = vmul.f32 %v4389_v55, %v4389_v55 }
 0x18d   :  { %2089 = vmatprep.mubr.f32.mxu1 %v1896_v1  ;;  %2160 = vmatprep.mubr.f32.mxu0 %v1896_v1 }
 0x18e   :  { %2090 = vmatmul.mubr.f32.vlgmr.msra.gmra.mrb[74].mxu1 %v1895_v30  ;;  %2161 = vmatmul.mubr.f32.vlgmr.msra.gmra.mrb[120].mxu0 %v1895_v30  ;;  %v2770_v5 = vpop.f32.mrb[76].mxu0  ;;  %v1704_v24 = vadd.f32 %v1703_v2, %v1673_v51 }
 0x18f   :  { %v2771_v48 = vpop.f32.mrb[77].mxu0 }
 0x190   :  { %v2772_v0 = vadd.f32 %v2771_v48, %v2770_v5  ;;  %v2773_v16 = vpop.f32.mrb[78].mxu0  ;;  %v1705_v54 = vadd.f32 %v1704_v24, %v1674_v31 }
 0x191   :  { %v2774_v9 = vpop.f32.mrb[79].mxu0 }
 0x192   :  { %v4401_v11 = vadd.f32 %v2772_v0, %v4304_v18  ;;  %v2775_v12 = vadd.f32 %v2774_v9, %v2773_v16  ;;  %v1706_v1 = vadd.f32 %v1705_v54, %v1675_v35  ;;  %v1676_v18 = vmul.f32 %v4392_v41, %v4392_v41 }
 0x194   :  { %v4406_v33 = vadd.f32 %v2775_v12, %v4306_v21  ;;  %v1677_v21 = vmul.f32 %v4401_v11, %v4401_v11  ;;  %v1707_v48 = vadd.f32 %v1706_v1, %v1676_v18 }
 0x196   :  { %v2776_v47 = vpop.f32.mrb[80].mxu0  ;;  %v1708_v0 = vadd.f32 %v1707_v48, %v1677_v21  ;;  %v1678_v16 = vmul.f32 %v4406_v33, %v4406_v33 }
 0x197   :  { %v2777_v49 = vpop.f32.mrb[81].mxu0 }
 0x198   :  { %v2778_v59 = vadd.f32 %v2777_v49, %v2776_v47  ;;  %v2779_v19 = vpop.f32.mrb[82].mxu0  ;;  %v1709_v35 = vadd.f32 %v1708_v0, %v1678_v16 }
 0x199   :  { %v2780_v61 = vpop.f32.mrb[83].mxu0 }
 0x19a   :  { %v4413_v30 = vadd.f32 %v2778_v59, %v4308_v37  ;;  %v2781_v4 = vadd.f32 %v2780_v61, %v2779_v19 }
 0x19c   :  { %v4418_v5 = vadd.f32 %v2781_v4, %v4310_v40  ;;  %v1679_v37 = vmul.f32 %v4413_v30, %v4413_v30 }
 0x19e   :  { %v2782_v8 = vpop.f32.mrb[84].mxu0  ;;  %v1710_v47 = vadd.f32 %v1709_v35, %v1679_v37  ;;  %v1680_v49 = vmul.f32 %v4418_v5, %v4418_v5 }
 0x19f   :  { %v2783_v51 = vpop.f32.mrb[85].mxu0 }
 0x1a0   :  { %v2784_v9 = vadd.f32 %v2783_v51, %v2782_v8  ;;  %v2785_v2 = vpop.f32.mrb[86].mxu0  ;;  %v1711_v4 = vadd.f32 %v1710_v47, %v1680_v49 }
 0x1a1   :  { %v2786_v12 = vpop.f32.mrb[87].mxu0 }
 0x1a2   :  { %v4425_v24 = vadd.f32 %v2784_v9, %v4312_v60  ;;  %v2787_v31 = vadd.f32 %v2786_v12, %v2785_v2 }
 0x1a4   :  { %v4428_v40 = vadd.f32 %v2787_v31, %v4314_v63  ;;  %v1681_v19 = vmul.f32 %v4425_v24, %v4425_v24 }
 0x1a6   :  { %v2788_v54 = vpop.f32.mrb[88].mxu0  ;;  %v1712_v48 = vadd.f32 %v1711_v4, %v1681_v19  ;;  %v1682_v63 = vmul.f32 %v4428_v40, %v4428_v40 }
 0x1a7   :  { %v2789_v59 = vpop.f32.mrb[89].mxu0 }
 0x1a8   :  { %v2790_v61 = vadd.f32 %v2789_v59, %v2788_v54  ;;  %v2791_v1 = vpop.f32.mrb[90].mxu0  ;;  %v1713_v9 = vadd.f32 %v1712_v48, %v1682_v63 }
 0x1a9   :  { %v2792_v18 = vpop.f32.mrb[91].mxu0 }
 0x1aa   :  { %v4435_v60 = vadd.f32 %v2790_v61, %v4316_v17  ;;  %v2793_v21 = vadd.f32 %v2792_v18, %v2791_v1 }
 0x1ac   :  { %v4440_v8 = vadd.f32 %v2793_v21, %v4318_v22  ;;  %v1683_v51 = vmul.f32 %v4435_v60, %v4435_v60 }
 0x1ae   :  { %v2794_v0 = vpop.f32.mrb[92].mxu0  ;;  %v1714_v31 = vadd.f32 %v1713_v9, %v1683_v51  ;;  %v1684_v17 = vmul.f32 %v4440_v8, %v4440_v8 }
 0x1af   :  { %v2795_v16 = vpop.f32.mrb[93].mxu0 }
 0x1b0   :  { %v2796_v2 = vadd.f32 %v2795_v16, %v2794_v0  ;;  %v2797_v12 = vpop.f32.mrb[94].mxu0  ;;  %v1715_v54 = vadd.f32 %v1714_v31, %v1684_v17 }
 0x1b1   :  { %v2798_v37 = vpop.f32.mrb[95].mxu0 }
 0x1b2   :  { %v4447_v35 = vadd.f32 %v2796_v2, %v4320_v39  ;;  %v2799_v47 = vadd.f32 %v2798_v37, %v2797_v12 }
 0x1b4   :  { %v1685_v22 = vmul.f32 %v4447_v35, %v4447_v35  ;;  %v4452_v49 = vadd.f32 %v2799_v47, %v4322_v44 }
 0x1b6   :  { %v2800_v59 = vpop.f32.mrb[96].mxu0  ;;  %v1716_v61 = vadd.f32 %v1715_v54, %v1685_v22  ;;  %v1686_v1 = vmul.f32 %v4452_v49, %v4452_v49 }
 0x1b7   :  { %v2801_v19 = vpop.f32.mrb[97].mxu0 }
 0x1b8   :  { %v2802_v18 = vadd.f32 %v2801_v19, %v2800_v59  ;;  %v2803_v4 = vpop.f32.mrb[98].mxu0  ;;  %v1717_v63 = vadd.f32 %v1716_v61, %v1686_v1 }
 0x1b9   :  { %v2804_v21 = vpop.f32.mrb[99].mxu0 }
 0x1ba   :  { %v4457_v39 = vadd.f32 %v2802_v18, %v4324_v3  ;;  %v2805_v48 = vadd.f32 %v2804_v21, %v2803_v4 }
 0x1bc   :  { %v1687_v51 = vmul.f32 %v4457_v39, %v4457_v39  ;;  %v4462_v44 = vadd.f32 %v2805_v48, %v4326_v6 }
 0x1be   :  { %v1718_v0 = vadd.f32 %v1717_v63, %v1687_v51  ;;  %v1688_v16 = vmul.f32 %v4462_v44, %v4462_v44  ;;  %v2806_v9 = vpop.f32.mrb[100].mxu0 }
 0x1bf   :  { %v2807_v2 = vpop.f32.mrb[101].mxu0 }
 0x1c0   :  { %v1719_v12 = vadd.f32 %v1718_v0, %v1688_v16  ;;  %v2808_v37 = vadd.f32 %v2807_v2, %v2806_v9  ;;  %v2809_v31 = vpop.f32.mrb[102].mxu0 }
 0x1c1   :  { %v2810_v17 = vpop.f32.mrb[103].mxu0 }
 0x1c2   :  { %v4467_v3 = vadd.f32 %v2808_v37, %v4328_v26  ;;  %v2811_v47 = vadd.f32 %v2810_v17, %v2809_v31 }
 0x1c4   :  { %v1689_v22 = vmul.f32 %v4467_v3, %v4467_v3  ;;  %v4472_v6 = vadd.f32 %v2811_v47, %v4330_v29 }
 0x1c6   :  { %v1720_v54 = vadd.f32 %v1719_v12, %v1689_v22  ;;  %v1690_v59 = vmul.f32 %v4472_v6, %v4472_v6  ;;  %v2812_v19 = vpop.f32.mrb[104].mxu0 }
 0x1c7   :  { %v2813_v61 = vpop.f32.mrb[105].mxu0 }
 0x1c8   :  { %v1721_v1 = vadd.f32 %v1720_v54, %v1690_v59  ;;  %v2814_v18 = vadd.f32 %v2813_v61, %v2812_v19  ;;  %v2815_v4 = vpop.f32.mrb[106].mxu0 }
 0x1c9   :  { %v2816_v21 = vpop.f32.mrb[107].mxu0 }
 0x1ca   :  { %v4477_v26 = vadd.f32 %v2814_v18, %v4332_v53  ;;  %v2817_v48 = vadd.f32 %v2816_v21, %v2815_v4 }
 0x1cc   :  { %v1691_v63 = vmul.f32 %v4477_v26, %v4477_v26  ;;  %v4482_v29 = vadd.f32 %v2817_v48, %v4334_v57 }
 0x1ce   :  { %v1722_v51 = vadd.f32 %v1721_v1, %v1691_v63  ;;  %v1692_v0 = vmul.f32 %v4482_v29, %v4482_v29  ;;  %v2818_v16 = vpop.f32.mrb[108].mxu0 }
 0x1cf   :  { %v2819_v9 = vpop.f32.mrb[109].mxu0 }
 0x1d0   :  { %v1723_v2 = vadd.f32 %v1722_v51, %v1692_v0  ;;  %v2820_v12 = vadd.f32 %v2819_v9, %v2818_v16  ;;  %v2821_v37 = vpop.f32.mrb[110].mxu0 }
 0x1d1   :  { %v2822_v31 = vpop.f32.mrb[111].mxu0 }
 0x1d2   :  { %v4487_v53 = vadd.f32 %v2820_v12, %v4336_v15  ;;  %v2823_v17 = vadd.f32 %v2822_v31, %v2821_v37  ;;  %v3291_v12 = vmov 1   ;;  %v3293_v37 = vmov 3  }
 0x1d4   :  { %v1693_v47 = vmul.f32 %v4487_v53, %v4487_v53  ;;  %v4492_v57 = vadd.f32 %v2823_v17, %v4338_v10 }
 0x1d6   :  { %v1724_v22 = vadd.f32 %v1723_v2, %v1693_v47  ;;  %v1694_v54 = vmul.f32 %v4492_v57, %v4492_v57  ;;  %v2824_v59 = vpop.f32.mrb[112].mxu0  ;;  %v2278_v2 = vld [vmem:[%s4629_s3] sm:$0xff] }
 0x1d7   :  { %v2825_v19 = vpop.f32.mrb[113].mxu0  ;;  %2280 = vperm.xlu0 %3072, %v2278_v2  }
 0x1d8   :  { %v4496_v61 = vadd.f32 %v1724_v22, %v1694_v54  ;;  %v4498_v1 = vadd.f32 %v2825_v19, %v2824_v59  ;;  %v2827_v18 = vpop.f32.mrb[114].mxu0 }
 0x1d9   :  { %v2828_v15 = vpop.f32.mrb[115].mxu0 }
 0x1da   :  { %v2829_v4 = vadd.f32 %v2828_v15, %v2827_v18 }
 0x1db   :  { %3073 = vset.pattern.permute.xlu0 %v3291_v12 }
 0x1dc   :  { %v4501_v21 = vadd.f32 %v2829_v4, %v4344_v45  ;;  %2287 = vperm.xlu0 %3073, %v2278_v2   ;;  %v3292_v45 = vmov 2  }
 0x1de   :  { %v2830_v48 = vpop.f32.mrb[116].mxu0 }
 0x1df   :  { %v2831_v63 = vpop.f32.mrb[117].mxu0 }
 0x1e0   :  { %v4503_v10 = vadd.f32 %v2831_v63, %v2830_v48  ;;  %v2833_v51 = vpop.f32.mrb[118].mxu0  ;;  %3074 = vset.pattern.permute.xlu0 %v3292_v45  ;;  %v252_v48 = vld [vmem:[%s4624_s6 + $0xc0] sm:$0xff]  ;;  %v254_v63 = vld [vmem:[%s4624_s6 + $0xd0] sm:$0xff] }
 0x1e1   :  { %v2834_v0 = vpop.f32.mrb[119].mxu0  ;;  %2294 = vperm.xlu0 %3074, %v2278_v2  }
 0x1e2   :  { %v2835_v16 = vadd.f32 %v2834_v0, %v2833_v51  ;;  %v256_v51 = vld [vmem:[%s4624_s6 + $0xe0] sm:$0xff]  ;;  %v258_v0 = vld [vmem:[%s4624_s6 + $0xf0] sm:$0xff] }
 0x1e4   :  { %v4506_v9 = vadd.f32 %v2835_v16, %v4350_v7  ;;  %v1792_v16 = vmax.f32 %v4108_v43, 1e-12 }
 0x1e5   :  { %3075 = vset.pattern.permute.xlu0 %v3293_v37 }
 0x1e6   :  { %2301 = vperm.xlu0 %3075, %v2278_v2   ;;  %v1781_v2 = vmax.f32 %v4134_v56, 1e-12  ;;  %3268 = vrsqrt.f32 %v1792_v16  ;;  %v3285_v56 = vld [vmem:[%s4622_s1] sm:$0xff] }
 0x1e8   :  { %3270 = vrsqrt.f32 %v1781_v2 }
 0x1f0   :  { %v3269_v37 = vpop.eup %3268 }
 0x261   :  { %v2091_v31 = vpop.f32.mrb[74].mxu1  ;;  %v2162_v17 = vpop.f32.mrb[120].mxu0 }
 0x262   :  { %v2167_v47 = vmul.f32 %v2091_v31, %v2091_v31  ;;  %v2093_v22 = vpop.f32.mrb[75].mxu1  ;;  %v2164_v7 = vpop.f32.mrb[121].mxu0  ;;  %v2169_v59 = vmul.f32 %v2162_v17, %v2162_v17 }
 0x263   :  { %v2168_v54 = vmul.f32 %v2093_v22, %v2093_v22  ;;  %v2170_v18 = vmul.f32 %v2164_v7, %v2164_v7 }
 0x265   :  { %v2171_v19 = vadd.f32 %v2168_v54, %v2167_v47  ;;  %v3271_v54 = vpop.eup %3270 }
 0x267   :  { %v2172_v15 = vadd.f32 %v2171_v19, %v2169_v59 }
 0x269   :  { %v2173_v4 = vadd.f32 %v2172_v15, %v2170_v18  ;;  %v3284_v15 = vld [vmem:[%s4623_s0] sm:$0xff] }
 0x26a   :  { %v1783_v43 = vmul.f32 %v3284_v15, %v3271_v54 }
 0x26b   :  { %2174 = vadd.xlane.f32.xlu1 %v2173_v4  ;;  %v1794_v4 = vmul.f32 %v3285_v56, %v3269_v37 }
 0x27c   :  { %382 = vperm.xlu1 %3071, %v252_v48   ;;  %v3286_v48 = vld [vmem:[%s4622_s1 + $0x8] sm:$0xff] }
 0x280   :  { %392 = vperm.xlu1 %3071, %v254_v63   ;;  %v1795_v63 = vmul.f32 %v3286_v48, %v3269_v37  ;;  %v2182_v37 = vmul.f32 0.70710677, %v1783_v43 }
 0x284   :  { %402 = vperm.xlu1 %3071, %v256_v51   ;;  %v3287_v51 = vld [vmem:[%s4623_s0 + $0x8] sm:$0xff] }
 0x288   :  { %412 = vperm.xlu1 %3071, %v258_v0   ;;  %v1784_v0 = vmul.f32 %v3287_v51, %v3271_v54 }
 0x2f8   :  { %v2175_v12 = vpop.xlane.xlu1 %2174 }
 0x2f9   :  { %v2176_v45 = vmax.f32 %v2175_v12, 1e-12  ;;  %v1696_v12 = vmul.f32 %v4501_v21, %v4501_v21 }
 0x2fb   :  { %3272 = vrsqrt.f32 %v2176_v45 }
 0x2fc   :  { %v383_v47 = vpop.permute.xlu1 %382 }
 0x2fd   :  { %v1319_v59 = vadd.f32 %v4340_v27, %v383_v47  ;;  %v2186_v47 = vmul.f32 0.70710677, %v1794_v4 }
 0x2ff   :  { %v1480_v19 = vadd.f32 %v4342_v32, %v1319_v59 }
 0x300   :  { %v393_v18 = vpop.permute.xlu1 %392 }
 0x301   :  { %v4537_v27 = vadd.f32 %v4498_v1, %v1480_v19  ;;  %v1327_v32 = vadd.f32 %v4346_v52, %v393_v18  ;;  %v2187_v1 = vmul.f32 0.70710677, %v1795_v63  ;;  %v2183_v18 = vmul.f32 0.70710677, %v1784_v0 }
 0x303   :  { %v1695_v16 = vmul.f32 %v4537_v27, %v4537_v27  ;;  %v1488_v2 = vadd.f32 %v4348_v58, %v1327_v32 }
 0x304   :  { %v403_v45 = vpop.permute.xlu1 %402 }
 0x305   :  { %v3273_v59 = vpop.eup %3272  ;;  %v1726_v52 = vadd.f32 %v4496_v61, %v1695_v16  ;;  %v4550_v19 = vadd.f32 %v4503_v10, %v1488_v2  ;;  %v1335_v54 = vadd.f32 %v4352_v13, %v403_v45  ;;  %v1698_v10 = vmul.f32 %v4506_v9, %v4506_v9 }
 0x306   :  { %v2178_v15 = vmul.f32 %v3273_v59, %v2091_v31  ;;  %v2179_v56 = vmul.f32 %v3273_v59, %v2093_v22  ;;  %v2180_v48 = vmul.f32 %v3273_v59, %v2162_v17  ;;  %v2181_v58 = vmul.f32 %v3273_v59, %v2164_v7 }
 0x307   :  { %v1727_v32 = vadd.f32 %v1726_v52, %v1696_v12  ;;  %v1697_v51 = vmul.f32 %v4550_v19, %v4550_v19  ;;  %v1496_v43 = vadd.f32 %v4354_v20, %v1335_v54  ;;  %v1700_v52 = vmul.f32 %v4371_v42, %v4371_v42 }
 0x308   :  { %v413_v4 = vpop.permute.xlu1 %412  ;;  %v2184_v63 = vadd.f32 %v2182_v37, %v2178_v15  ;;  %v2185_v38 = vadd.f32 %v2183_v18, %v2179_v56  ;;  %v2188_v61 = vadd.f32 %v2186_v47, %v2180_v48  ;;  %v2189_v16 = vadd.f32 %v2187_v1, %v2181_v58 }
 0x309   :  { %v1728_v13 = vadd.f32 %v1727_v32, %v1697_v51  ;;  %v1657_v31 = vadd.f32 %v4360_v23, %v1496_v43  ;;  %v1343_v17 = vadd.f32 %v4356_v46, %v413_v4  ;;  %v1702_v56 = vmul.f32 %v4386_v25, %v4386_v25 }
 0x30a   :  { %v2190_v22 = vmul.f32 %v2184_v63, %v2184_v63  ;;  %v2191_v7 = vmul.f32 %v2185_v38, %v2185_v38  ;;  %v2192_v0 = vmul.f32 %v2188_v61, %v2188_v61  ;;  %v2193_v2 = vmul.f32 %v2189_v16, %v2189_v16 }
 0x30b   :  { %v1729_v12 = vadd.f32 %v1728_v13, %v1698_v10  ;;  %v1699_v45 = vmul.f32 %v1657_v31, %v1657_v31  ;;  %v1504_v20 = vadd.f32 %v4358_v50, %v1343_v17  ;;  %v4561_v37 = vadd.f32 %v2189_v16, %v2185_v38 }
 0x30c   :  { %v2194_v47 = vadd.f32 %v2192_v0, %v2190_v22  ;;  %v2195_v1 = vadd.f32 %v2193_v2, %v2191_v7  ;;  %v4563_v59 = vadd.f32 %v2188_v61, %v2184_v63 }
 0x30d   :  { %v1730_v23 = vadd.f32 %v1729_v12, %v1699_v45  ;;  %v1665_v46 = vadd.f32 %v4374_v62, %v1504_v20 }
 0x30e   :  { %v2196_v54 = vadd.f32 %v2195_v1, %v2194_v47 }
 0x30f   :  { %v1731_v18 = vadd.f32 %v1730_v23, %v1700_v52  ;;  %v1701_v15 = vmul.f32 %v1665_v46, %v1665_v46 }
 0x310   :  { %2197 = vadd.xlane.f32.xlu1 %v2196_v54 }
 0x311   :  { %v1732_v50 = vadd.f32 %v1731_v18, %v1701_v15 }
 0x313   :  { %v1733_v38 = vadd.f32 %v1732_v50, %v1702_v56 }
 0x315   :  { %v1734_v48 = vrot.slane %v1733_v38, 4 }
 0x317   :  { %v1735_v58 = vadd.f32 %v1734_v48, %v1733_v38 }
 0x319   :  { %v1736_v32 = vrot.slane %v1735_v58, 2 }
 0x31b   :  { %v1737_v51 = vadd.f32 %v1736_v32, %v1735_v58  ;;  %v4638_v58 = vlaneseq }
 0x31d   :  { %v1738_v43 = vrot.slane %v1737_v51, 1  ;;  %v4603_v32 = vand.u32 127, %v4638_v58 }
 0x31f   :  { %v1739_v4 = vadd.f32 %v1738_v43, %v1737_v51  ;;  %vm2332_vm4 = vcmp.lt.s32.totalorder %v4603_v32, 20  ;;  %vm2352_vm11 = vcmp.eq.s32.totalorder %v4603_v32, 20 }
 0x321   :  { %v1740_v63 = vmax.f32 %v1739_v4, 1e-12  ;;  %v4639_v4 = vmov 0.0  }
 0x323   :  { %3274 = vrsqrt.f32 %v1740_v63  ;;  %v2511_v63 = vsel %vm2332_vm4, 1.0, %v4639_v4 }
 0x32d   :  { %v3275_v61 = vpop.eup %3274 }
 0x32e   :  { %v1742_v62 = vmul.f32 %v3275_v61, %v4363_v28  ;;  %v1743_v16 = vmul.f32 %v3275_v61, %v4366_v36  ;;  %v1758_v10 = vmul.f32 %v3275_v61, %v4457_v39  ;;  %v1759_v13 = vmul.f32 %v3275_v61, %v4462_v44 }
 0x32f   :  { %v1760_v17 = vmul.f32 %v3275_v61, %v4467_v3  ;;  %v1761_v22 = vmul.f32 %v3275_v61, %v4472_v6  ;;  %v1762_v7 = vmul.f32 %v3275_v61, %v4477_v26  ;;  %v1763_v0 = vmul.f32 %v3275_v61, %v4482_v29 }
 0x330   :  { %v1764_v2 = vmul.f32 %v3275_v61, %v4487_v53  ;;  %v1765_v12 = vmul.f32 %v3275_v61, %v4492_v57  ;;  %v1767_v28 = vmul.f32 %v3275_v61, %v4501_v21  ;;  %v1769_v36 = vmul.f32 %v3275_v61, %v4506_v9 }
 0x331   :  { %v1771_v39 = vmul.f32 %v3275_v61, %v4371_v42  ;;  %v1773_v44 = vmul.f32 %v3275_v61, %v4386_v25  ;;  %v1744_v3 = vmul.f32 %v3275_v61, %v4381_v34  ;;  %v1745_v6 = vmul.f32 %v3275_v61, %v4384_v14 }
 0x332   :  { %v3019_v45 = vpack.c.bf16 %v1743_v16, %v1742_v62  ;;  %v3017_v26 = vpack.c.bf16 %v1759_v13, %v1758_v10  ;;  %v3021_v20 = vpack.c.bf16 %v1761_v22, %v1760_v17  ;;  %v3025_v29 = vpack.c.bf16 %v1763_v0, %v1762_v7 }
 0x333   :  { %v3029_v47 = vpack.c.bf16 %v1765_v12, %v1764_v2  ;;  %v1766_v53 = vmul.f32 %v3275_v61, %v4537_v27  ;;  %v1768_v57 = vmul.f32 %v3275_v61, %v4550_v19  ;;  %v1770_v21 = vmul.f32 %v3275_v61, %v1657_v31 }
 0x334   :  { %v1772_v1 = vmul.f32 %v3275_v61, %v1665_v46  ;;  %3018 = vmatprep.subr.bf16.mxu1 %v3017_v26  ;;  %v1746_v34 = vmul.f32 %v3275_v61, %v4389_v55  ;;  %v1747_v14 = vmul.f32 %v3275_v61, %v4392_v41  ;;  %v3023_v23 = vpack.c.bf16 %v1745_v6, %v1744_v3 }
 0x335   :  { %3020 = vmatpush3.bf16.msra.mxu1 %v3019_v45  ;;  %v3033_v42 = vpack.c.bf16 %v1767_v28, %v1766_v53  ;;  %v3037_v9 = vpack.c.bf16 %v1769_v36, %v1768_v57  ;;  %v3041_v25 = vpack.c.bf16 %v1771_v39, %v1770_v21  ;;  %v1748_v27 = vmul.f32 %v3275_v61, %v4401_v11 }
 0x336   :  { %v3045_v52 = vpack.c.bf16 %v1773_v44, %v1772_v1  ;;  %3022 = vmatprep.subr.bf16.mxu1 %v3021_v20  ;;  %v1749_v19 = vmul.f32 %v3275_v61, %v4406_v33  ;;  %v3027_v31 = vpack.c.bf16 %v1747_v14, %v1746_v34  ;;  %v1750_v46 = vmul.f32 %v3275_v61, %v4413_v30 }
 0x337   :  { %v1751_v54 = vmul.f32 %v3275_v61, %v4418_v5  ;;  %v1752_v55 = vmul.f32 %v3275_v61, %v4425_v24  ;;  %v1753_v41 = vmul.f32 %v3275_v61, %v4428_v40  ;;  %v1754_v11 = vmul.f32 %v3275_v61, %v4435_v60 }
 0x338   :  { %v3031_v18 = vpack.c.bf16 %v1749_v19, %v1748_v27  ;;  %v1755_v33 = vmul.f32 %v3275_v61, %v4440_v8  ;;  %v1756_v30 = vmul.f32 %v3275_v61, %v4447_v35  ;;  %v1757_v5 = vmul.f32 %v3275_v61, %v4452_v49  ;;  %v2281_v61 = vpop.permute.xlu0 %2280 }
 0x339   :  { %3024 = vmatpush3.bf16.msra.mxu1 %v3023_v23  ;;  %v3035_v15 = vpack.c.bf16 %v1751_v54, %v1750_v46  ;;  %v3039_v56 = vpack.c.bf16 %v1753_v41, %v1752_v55  ;;  %vm2282_vm5 = vcmp.eq.s32.totalorder %v4603_v32, %v2281_v61 }
 0x33a   :  { %3026 = vmatprep.subr.bf16.mxu1 %v3025_v29  ;;  %v3043_v50 = vpack.c.bf16 %v1755_v33, %v1754_v11  ;;  %v3047_v24 = vpack.c.bf16 %v1757_v5, %v1756_v30  ;;  %v4640_v33 = vld [vmem:[#allocation2_spill] sm:$0xff] }
 0x33b   :  { %vm2351_vm10 = vcmp.eq.s32.totalorder %v4640_v33, 0 }
 0x33c   :  { %v2288_v13 = vpop.permute.xlu0 %2287  ;;  %vm2353_vm12 = vmand %vm2351_vm10, %vm2352_vm11 }
 0x33d   :  { %3028 = vmatpush3.bf16.msra.mxu1 %v3027_v31  ;;  %vm2289_vm6 = vcmp.eq.s32.totalorder %v4603_v32, %v2288_v13 }
 0x33e   :  { %3030 = vmatprep.subr.bf16.mxu1 %v3029_v47  ;;  %v2508_v7 = vsel %vm2289_vm6, 1.0, %v4639_v4 }
 0x340   :  { %v2295_v17 = vpop.permute.xlu0 %2294 }
 0x341   :  { %3032 = vmatpush3.bf16.msra.mxu1 %v3031_v18  ;;  %vm2296_vm7 = vcmp.eq.s32.totalorder %v4603_v32, %v2295_v17 }
 0x342   :  { %3034 = vmatprep.subr.bf16.mxu1 %v3033_v42  ;;  %v2509_v36 = vsel %vm2296_vm7, 1.0, %v4639_v4 }
 0x344   :  { %v2302_v2 = vpop.permute.xlu0 %2301 }
 0x345   :  { %3036 = vmatpush3.bf16.msra.mxu1 %v3035_v15  ;;  %vm2303_vm8 = vcmp.eq.s32.totalorder %v4603_v32, %v2302_v2 }
 0x346   :  { %3038 = vmatprep.subr.bf16.mxu1 %v3037_v9  ;;  %v2510_v44 = vsel %vm2303_vm8, 1.0, %v4639_v4 }
 0x349   :  { %3040 = vmatpush3.bf16.msra.mxu1 %v3039_v56 }
 0x34a   :  { %3042 = vmatprep.subr.bf16.mxu1 %v3041_v25 }
 0x34d   :  { %3044 = vmatpush3.bf16.msra.mxu1 %v3043_v50 }
 0x34e   :  { %3046 = vmatprep.subr.bf16.mxu1 %v3045_v52 }
 0x351   :  { %3048 = vmatpush3.bf16.msra.mxu1 %v3047_v24 }
 0x39d   :  { %v2198_v40 = vpop.xlane.xlu1 %2197 }
 0x39e   :  { %v2201_v38 = vmax.f32 %v2198_v40, 1e-12 }
 0x3a0   :  { %3276 = vrsqrt.f32 %v2201_v38 }
 0x3aa   :  { %v3277_v48 = vpop.eup %3276 }
 0x3ab   :  { %v2204_v60 = vmul.f32 %v3277_v48, %v4561_v37  ;;  %v2203_v8 = vmul.f32 %v3277_v48, %v4563_v59  ;;  %v2507_v59 = vsel %vm2282_vm5, 1.0, %v4639_v4 }
 0x3ac   :  { %v2285_v22 = vmax.f32 %v2507_v59, 0.0 }
 0x3ad   :  { %2269 = vmatprep.mubr.f32.mxu1 %v2204_v60 }
 0x3ae   :  { %2270 = vmatmul.mubr.f32.vlgmr.msra.gmra.mrb[76].mxu1 %v2203_v8  ;;  %v2292_v28 = vmax.f32 %v2285_v22, %v2508_v7 }
 0x3b0   :  { %v2299_v39 = vmax.f32 %v2292_v28, %v2509_v36 }
 0x3b2   :  { %v2306_v3 = vmax.f32 %v2299_v39, %v2510_v44 }
 0x3b4   :  { %v2325_v53 = vsub.f32 1.0, %v2306_v3  ;;  %v2329_v1 = vmul.f32 0.25, %v2306_v3 }
 0x3b6   :  { %v2330_v52 = vmul.f32 0.75, %v2325_v53 }
 0x3b8   :  { %v2331_v27 = vadd.f32 %v2330_v52, %v2329_v1 }
 0x481   :  { %v2880_v35 = vpop.f32.mrb[76].mxu1 }
 0x482   :  { %v2881_v49 = vpop.f32.mrb[77].mxu1 }
 0x483   :  { %v2882_v51 = vadd.f32 %v2881_v49, %v2880_v35 }
 0x485   :  { %v2275_v43 = vmul.f32 10.101525, %v2882_v51 }
 0x487   :  { %v2307_v62 = vand.u32 2147483647, %v2275_v43  ;;  %v2350_v16 = vmul.f32 %v2511_v63, %v2275_v43  ;;  %vm2314_vm9 = vcmp.ge.f32.partialorder %v2275_v43, 0.0  ;;  %v2317_v29 = vmax.f32 %v2275_v43, 0.0 }
 0x488   :  { %v2318_v47 = vmul.f32 %v2306_v3, %v2275_v43 }
 0x489   :  { %v2308_v10 = vsub.f32 0.0, %v2307_v62 }
 0x48a   :  { %v2319_v42 = vsub.f32 %v2317_v29, %v2318_v47 }
 0x48b   :  { %v2309_v37 = vmul.f32 1.442695, %v2308_v10 }
 0x48d   :  { %3278 = vpow2.f32 %v2309_v37 }
 0x497   :  { %v3279_v0 = vpop.eup %3278 }
 0x498   :  { %v2311_v12 = vadd.f32 1.0, %v3279_v0  ;;  %v2315_v45 = vsel %vm2314_vm9, 1.0, %v3279_v0 }
 0x49a   :  { %3280 = vrcp.f32 %v2311_v12 }
 0x49b   :  { %3282 = vlog2.f32 %v2311_v12 }
 0x4a4   :  { %v3281_v6 = vpop.eup %3280 }
 0x4a5   :  { %v3283_v26 = vpop.eup %3282  ;;  %v2316_v20 = vmul.f32 %v3281_v6, %v2315_v45 }
 0x4a6   :  { %v2321_v57 = vmul.f32 0.6931472, %v3283_v26 }
 0x4a7   :  { %v2324_v21 = vsub.f32 1.0, %v2316_v20  ;;  %v2323_v9 = vmul.f32 %v2316_v20, %v2306_v3 }
 0x4a8   :  { %v2322_v34 = vadd.f32 %v2321_v57, %v2319_v42 }
 0x4a9   :  { %v2326_v25 = vmul.f32 %v2325_v53, %v2324_v21 }
 0x4aa   :  { %v2335_v19 = vmul.f32 %v2331_v27, %v2322_v34 }
 0x4ab   :  { %v2327_v14 = vadd.f32 %v2326_v25, %v2323_v9 }
 0x4ad   :  { %v2328_v23 = vsub.f32 1.0, %v2327_v14 }
 0x4af   :  { %v2336_v31 = vmul.f32 %v2328_v23, %v2328_v23 }
 0x4b1   :  { %v2337_v46 = vmul.f32 %v2336_v31, %v2335_v19 }
 0x4b3   :  { %v2338_v54 = vmul.f32 %v2511_v63, %v2337_v46 }
 0x4b5   :  { %2339 = vadd.xlane.f32.xlu0 %v2338_v54 }
 0x542   :  { %v2340_v18 = vpop.xlane.xlu0 %2339 }
 0x543   :  { %v2341_v55 = vrot.slane %v2340_v18, 4 }
 0x545   :  { %v2342_v41 = vadd.f32 %v2341_v55, %v2340_v18 }
 0x547   :  { %v2343_v15 = vrot.slane %v2342_v41, 2 }
 0x549   :  { %v2344_v11 = vadd.f32 %v2343_v15, %v2342_v41 }
 0x54b   :  { %v2345_v56 = vrot.slane %v2344_v11, 1 }
 0x54d   :  { %v2346_v30 = vadd.f32 %v2345_v56, %v2344_v11 }
 0x54f   :  { %v2347_v5 = vmul.f32 0.00625, %v2346_v30 }
 0x551   :  { %v2354_v50 = vsel %vm2353_vm12, %v2347_v5, %v2350_v16 }
 0x552   :  { %2355 = vst [vmem:[%s4630_s10] sm:$0xff] %v2354_v50 }

</bundles_post_ra>
